<compile_context>
chip_gen: v7x
topology: tpu7x:2x2x1
jax: 0.10.0
libtpu: 0.0.40
codegen_flags: <defaults>
</compile_context>

<pallas_src>
import functools

import jax
import jax.numpy as jnp
from jax import lax
from jax.experimental import pallas as pl
from jax.experimental.pallas import tpu as pltpu


# ----------------------------------------------------------------------------
# Pallas kernel: 3x3 same-pad conv + bias + ReLU (+ optional fused 2x2 maxpool)
# ----------------------------------------------------------------------------
def conv3x3_relu_kernel(x_ref, w_ref, b_ref, o_ref, *, th, pool):
    """Computes `th` conv-output rows per grid step.

    Grid = (N, num_row_strips).

    x_ref: (1, H+2, W+2, Cin)  bf16  zero-padded image (index_map ignores the
                                     strip axis, so the block stays resident)
    w_ref: (9, Cin, Cout)      bf16  3x3 taps, host-prepped slab
    b_ref: (1, Cout)           f32
    o_ref: (1, th[/2], W[/2], Cout)  bf16 output strip
    """
    W = x_ref.shape[2] - 2
    Cin = x_ref.shape[3]
    Cout = o_ref.shape[3]
    row0 = pl.program_id(1) * th  # first conv-output row of this strip

    acc = jnp.zeros((th * W, Cout), jnp.float32)
    # Conv as 9 shifted (th*W, Cin) @ (Cin, Cout) bf16 matmuls on the MXU with
    # a shared f32 accumulator.
    # TODO(synk): fuse taps into a single deeper-K (9*Cin) im2col matmul once
    # unaligned lane-dim concatenation is verified on the target Mosaic build.
    for ky in range(3):
        for kx in range(3):
            patch = x_ref[0, pl.ds(row0 + ky, th), kx:kx + W, :]
            acc = acc + jnp.dot(
                patch.reshape(th * W, Cin),
                w_ref[ky * 3 + kx],
                preferred_element_type=jnp.float32,
            )

    acc = jnp.maximum(acc + b_ref[...], 0.0)  # bias + ReLU, single hoisted epilogue
    y = acc.reshape(th, W, Cout)
    if pool:  # fused 2x2 stride-2 max pool (unit-index selects, no strided ds)
        y = y.reshape(th // 2, 2, W, Cout)
        y = jnp.maximum(y[:, 0], y[:, 1])
        y = y.reshape(th // 2, W // 2, 2, Cout)
        y = jnp.maximum(y[:, :, 0], y[:, :, 1])
    o_ref[0] = y.astype(o_ref.dtype)


# ----------------------------------------------------------------------------
# Wrapper (pallas_call plumbing)
# ----------------------------------------------------------------------------
def _strip_rows(h):
    # Conv-output rows per grid step: a multiple of 8 (sublane-friendly M tile,
    # keeps the (th*W, Cout) f32 accumulator small) that divides H evenly.
    for th in (8, 4, 2):
        if h % th == 0:
            return th
    return h


def conv3x3_relu(x, w9, b2, *, pool=False):
    """x: (N, H, W, Cin) bf16; w9: (9, Cin, Cout) bf16; b2: (1, Cout) f32."""
    N, H, W, Cin = x.shape
    Cout = w9.shape[-1]
    th = _strip_rows(H)
    if pool:
        assert th % 2 == 0 and W % 2 == 0, (H, W)
    num_strips = H // th
    tho, Wo = (th // 2, W // 2) if pool else (th, W)
    Ho = num_strips * tho

    # TODO(synk): the zero-pad is still a separate XLA op (one extra HBM
    # round-trip per layer); folding it into the producing kernel's epilogue
    # would remove it.
    xp = jnp.pad(x, ((0, 0), (1, 1), (1, 1), (0, 0)))

    kernel = functools.partial(conv3x3_relu_kernel, th=th, pool=pool)
    return pl.pallas_call(
        kernel,
        out_shape=jax.ShapeDtypeStruct((N, Ho, Wo, Cout), jnp.bfloat16),
        grid_spec=pltpu.PrefetchScalarGridSpec(
            num_scalar_prefetch=0,
            grid=(N, num_strips),
            in_specs=[
                # Full padded image per batch element; constant along the strip
                # axis so it is not re-fetched per strip.
                pl.BlockSpec((1, H + 2, W + 2, Cin), lambda n, r: (n, 0, 0, 0)),
                pl.BlockSpec((9, Cin, Cout), lambda n, r: (0, 0, 0)),
                pl.BlockSpec((1, Cout), lambda n, r: (0, 0)),
            ],
            out_specs=pl.BlockSpec((1, tho, Wo, Cout), lambda n, r: (n, r, 0, 0)),
        ),
        compiler_params=pltpu.CompilerParams(
            dimension_semantics=("parallel", "parallel")),
    )(xp, w9, b2)


# ----------------------------------------------------------------------------
# TruncatedVGG19 (i=2, j=2) forward
# ----------------------------------------------------------------------------
# Each entry: (Cin, Cout, fuse_pool) for a 3x3 Conv2d + ReLU.  The original
# nn.MaxPool2d(2, 2) after conv1_2 is fused into that conv's epilogue.
VGG_LAYERS = [
    (3, 64, False),     # conv1_1 + ReLU
    (64, 64, True),     # conv1_2 + ReLU + MaxPool2x2 (fused)
    (64, 128, False),   # conv2_1 + ReLU
    (128, 128, False),  # conv2_2 + ReLU
]


def init_params(key):
    # TODO(synk): torchvision's pretrained VGG19 weights cannot be loaded in a
    # self-contained script; deterministic He-style synthetic weights with the
    # correct VGG19 shapes are used instead.
    params = []
    for cin, cout, _ in VGG_LAYERS:
        key, wk, bk = jax.random.split(key, 3)
        scale = (2.0 / (cin * 9)) ** 0.5
        w = scale * jax.random.normal(wk, (3, 3, cin, cout), jnp.float32)
        b = 0.01 * jax.random.normal(bk, (cout,), jnp.float32)
        # Host-side prep, done once: bf16 (9, Cin, Cout) weight slab for the
        # bf16 MXU path + (1, Cout) f32 bias for the f32 accumulator.
        params.append((w.reshape(9, cin, cout).astype(jnp.bfloat16),
                       b.reshape(1, cout)))
    return params


def truncated_vgg19_forward(x_nchw, params):
    """x_nchw: (N, 3, H, W) like the PyTorch module; returns (N, 128, H/2, W/2) f32."""
    x = jnp.transpose(x_nchw, (0, 2, 3, 1)).astype(jnp.bfloat16)  # NCHW -> NHWC bf16
    for (_, _, pool), (w9, b2) in zip(VGG_LAYERS, params):
        x = conv3x3_relu(x, w9, b2, pool=pool)
    return jnp.transpose(x, (0, 3, 1, 2)).astype(jnp.float32)     # -> NCHW f32


def reference_forward(x_nchw, params):
    """Pure-JAX/XLA reference with matching bf16-operand / f32-accum numerics."""
    x = jnp.transpose(x_nchw, (0, 2, 3, 1)).astype(jnp.bfloat16)
    for (cin, cout, pool), (w9, b2) in zip(VGG_LAYERS, params):
        w = w9.reshape(3, 3, cin, cout)  # HWIO, bf16
        y = lax.conv_general_dilated(
            x, w, (1, 1), "SAME",
            dimension_numbers=("NHWC", "HWIO", "NHWC"),
            preferred_element_type=jnp.float32)
        y = jnp.maximum(y + b2, 0.0)
        if pool:
            y = lax.reduce_window(y, -jnp.inf, lax.max,
                                  (1, 2, 2, 1), (1, 2, 2, 1), "VALID")
        x = y.astype(jnp.bfloat16)
    return jnp.transpose(x, (0, 3, 1, 2)).astype(jnp.float32)


if __name__ == "__main__":
    key = jax.random.PRNGKey(0)
    kx_, kp = jax.random.split(key)
    # Small shapes: N=2, 3 input channels (VGG expects RGB), 16x16 spatial.
    x = jax.random.normal(kx_, (2, 3, 16, 16), jnp.float32)
    params = init_params(kp)

    out = truncated_vgg19_forward(x, params)
    out = jax.block_until_ready(out)
    assert out.shape == (2, 128, 8, 8), out.shape

    ref = reference_forward(x, params)
    max_err = float(jnp.max(jnp.abs(out - ref)))
    scale = float(jnp.max(jnp.abs(ref))) + 1e-6
    # bf16 MXU operands: compare against a bf16-operand reference with a
    # correspondingly loosened (relative) tolerance.
    assert max_err <= 3e-2 * scale, f"mismatch vs reference: {max_err} (scale={scale})"
    print("KERNEL_OK")
</pallas_src>

<mosaic_0001>
module attributes {stable_mosaic.version = 11 : i64} {
  func.func @conv3x3_relu_kernel(%arg0: i32, %arg1: i32, %arg2: memref<1x18x18x3xbf16, #tpu.memory_space<vmem>>, %arg3: memref<9x3x64xbf16, #tpu.memory_space<vmem>>, %arg4: memref<1x64xf32, #tpu.memory_space<vmem>>, %arg5: memref<1x8x16x64xbf16, #tpu.memory_space<vmem>>) attributes {dimension_semantics = [#tpu.dimension_semantics<parallel>, #tpu.dimension_semantics<parallel>], iteration_bounds = array<i64: 2, 2>, scalar_prefetch = 0 : i64, scratch_operands = 0 : i64, tpu.core_type = #tpu.core_type<tc>, window_params = [{transform_indices = @transform_0, window_bounds = array<i64: 1, 18, 18, 3>}, {pipeline_mode = #tpu.pipeline_mode<synchronous>, transform_indices = @transform_1, window_bounds = array<i64: 9, 3, 64>}, {pipeline_mode = #tpu.pipeline_mode<synchronous>, transform_indices = @transform_2, window_bounds = array<i64: 1, 64>}, {transform_indices = @transform_3, window_bounds = array<i64: 1, 8, 16, 64>}]} {
    %c8_i32 = arith.constant 8 : i32
    %0 = arith.muli %arg1, %c8_i32 : i32
    %cst = arith.constant 0.000000e+00 : f32
    %1 = vector.broadcast %cst : f32 to vector<128x64xf32>
    %c0_i32 = arith.constant 0 : i32
    %2 = arith.addi %0, %c0_i32 : i32
    %c0 = arith.constant 0 : index
    %3 = arith.index_cast %2 : i32 to index
    %c0_0 = arith.constant 0 : index
    %c0_1 = arith.constant 0 : index
    %4 = vector.load %arg2[%c0, %3, %c0_0, %c0_1] : memref<1x18x18x3xbf16, #tpu.memory_space<vmem>>, vector<1x8x16x3xbf16>
    %5 = vector.shape_cast %4 : vector<1x8x16x3xbf16> to vector<8x16x3xbf16>
    %6 = vector.shape_cast %5 : vector<8x16x3xbf16> to vector<128x3xbf16>
    %c0_2 = arith.constant 0 : index
    %c0_3 = arith.constant 0 : index
    %c0_4 = arith.constant 0 : index
    %7 = vector.load %arg3[%c0_2, %c0_3, %c0_4] : memref<9x3x64xbf16, #tpu.memory_space<vmem>>, vector<1x3x64xbf16>
    %8 = vector.shape_cast %7 : vector<1x3x64xbf16> to vector<3x64xbf16>
    %cst_5 = arith.constant dense<0.000000e+00> : vector<128x64xf32>
    %9 = tpu.matmul %6, %8, %cst_5 {dimension_numbers = #tpu.dot_dimension_numbers<[1], [0], [0], [1], [0, 0, 1, 1], [], []>} : vector<128x3xbf16>, vector<3x64xbf16>, vector<128x64xf32> -> vector<128x64xf32>
    %10 = arith.addf %1, %9 : vector<128x64xf32>
    %c0_i32_6 = arith.constant 0 : i32
    %11 = arith.addi %0, %c0_i32_6 : i32
    %c0_7 = arith.constant 0 : index
    %12 = arith.index_cast %11 : i32 to index
    %c1 = arith.constant 1 : index
    %c0_8 = arith.constant 0 : index
    %13 = vector.load %arg2[%c0_7, %12, %c1, %c0_8] : memref<1x18x18x3xbf16, #tpu.memory_space<vmem>>, vector<1x8x16x3xbf16>
    %14 = vector.shape_cast %13 : vector<1x8x16x3xbf16> to vector<8x16x3xbf16>
    %15 = vector.shape_cast %14 : vector<8x16x3xbf16> to vector<128x3xbf16>
    %c1_9 = arith.constant 1 : index
    %c0_10 = arith.constant 0 : index
    %c0_11 = arith.constant 0 : index
    %16 = vector.load %arg3[%c1_9, %c0_10, %c0_11] : memref<9x3x64xbf16, #tpu.memory_space<vmem>>, vector<1x3x64xbf16>
    %17 = vector.shape_cast %16 : vector<1x3x64xbf16> to vector<3x64xbf16>
    %cst_12 = arith.constant dense<0.000000e+00> : vector<128x64xf32>
    %18 = tpu.matmul %15, %17, %cst_12 {dimension_numbers = #tpu.dot_dimension_numbers<[1], [0], [0], [1], [0, 0, 1, 1], [], []>} : vector<128x3xbf16>, vector<3x64xbf16>, vector<128x64xf32> -> vector<128x64xf32>
    %19 = arith.addf %10, %18 : vector<128x64xf32>
    %c0_i32_13 = arith.constant 0 : i32
    %20 = arith.addi %0, %c0_i32_13 : i32
    %c0_14 = arith.constant 0 : index
    %21 = arith.index_cast %20 : i32 to index
    %c2 = arith.constant 2 : index
    %c0_15 = arith.constant 0 : index
    %22 = vector.load %arg2[%c0_14, %21, %c2, %c0_15] : memref<1x18x18x3xbf16, #tpu.memory_space<vmem>>, vector<1x8x16x3xbf16>
    %23 = vector.shape_cast %22 : vector<1x8x16x3xbf16> to vector<8x16x3xbf16>
    %24 = vector.shape_cast %23 : vector<8x16x3xbf16> to vector<128x3xbf16>
    %c2_16 = arith.constant 2 : index
    %c0_17 = arith.constant 0 : index
    %c0_18 = arith.constant 0 : index
    %25 = vector.load %arg3[%c2_16, %c0_17, %c0_18] : memref<9x3x64xbf16, #tpu.memory_space<vmem>>, vector<1x3x64xbf16>
    %26 = vector.shape_cast %25 : vector<1x3x64xbf16> to vector<3x64xbf16>
    %cst_19 = arith.constant dense<0.000000e+00> : vector<128x64xf32>
    %27 = tpu.matmul %24, %26, %cst_19 {dimension_numbers = #tpu.dot_dimension_numbers<[1], [0], [0], [1], [0, 0, 1, 1], [], []>} : vector<128x3xbf16>, vector<3x64xbf16>, vector<128x64xf32> -> vector<128x64xf32>
    %28 = arith.addf %19, %27 : vector<128x64xf32>
    %c1_i32 = arith.constant 1 : i32
    %29 = arith.addi %0, %c1_i32 : i32
    %c0_20 = arith.constant 0 : index
    %30 = arith.index_cast %29 : i32 to index
    %c0_21 = arith.constant 0 : index
    %c0_22 = arith.constant 0 : index
    %31 = vector.load %arg2[%c0_20, %30, %c0_21, %c0_22] : memref<1x18x18x3xbf16, #tpu.memory_space<vmem>>, vector<1x8x16x3xbf16>
    %32 = vector.shape_cast %31 : vector<1x8x16x3xbf16> to vector<8x16x3xbf16>
    %33 = vector.shape_cast %32 : vector<8x16x3xbf16> to vector<128x3xbf16>
    %c3 = arith.constant 3 : index
    %c0_23 = arith.constant 0 : index
    %c0_24 = arith.constant 0 : index
    %34 = vector.load %arg3[%c3, %c0_23, %c0_24] : memref<9x3x64xbf16, #tpu.memory_space<vmem>>, vector<1x3x64xbf16>
    %35 = vector.shape_cast %34 : vector<1x3x64xbf16> to vector<3x64xbf16>
    %cst_25 = arith.constant dense<0.000000e+00> : vector<128x64xf32>
    %36 = tpu.matmul %33, %35, %cst_25 {dimension_numbers = #tpu.dot_dimension_numbers<[1], [0], [0], [1], [0, 0, 1, 1], [], []>} : vector<128x3xbf16>, vector<3x64xbf16>, vector<128x64xf32> -> vector<128x64xf32>
    %37 = arith.addf %28, %36 : vector<128x64xf32>
    %c1_i32_26 = arith.constant 1 : i32
    %38 = arith.addi %0, %c1_i32_26 : i32
    %c0_27 = arith.constant 0 : index
    %39 = arith.index_cast %38 : i32 to index
    %c1_28 = arith.constant 1 : index
    %c0_29 = arith.constant 0 : index
    %40 = vector.load %arg2[%c0_27, %39, %c1_28, %c0_29] : memref<1x18x18x3xbf16, #tpu.memory_space<vmem>>, vector<1x8x16x3xbf16>
    %41 = vector.shape_cast %40 : vector<1x8x16x3xbf16> to vector<8x16x3xbf16>
    %42 = vector.shape_cast %41 : vector<8x16x3xbf16> to vector<128x3xbf16>
    %c4 = arith.constant 4 : index
    %c0_30 = arith.constant 0 : index
    %c0_31 = arith.constant 0 : index
    %43 = vector.load %arg3[%c4, %c0_30, %c0_31] : memref<9x3x64xbf16, #tpu.memory_space<vmem>>, vector<1x3x64xbf16>
    %44 = vector.shape_cast %43 : vector<1x3x64xbf16> to vector<3x64xbf16>
    %cst_32 = arith.constant dense<0.000000e+00> : vector<128x64xf32>
    %45 = tpu.matmul %42, %44, %cst_32 {dimension_numbers = #tpu.dot_dimension_numbers<[1], [0], [0], [1], [0, 0, 1, 1], [], []>} : vector<128x3xbf16>, vector<3x64xbf16>, vector<128x64xf32> -> vector<128x64xf32>
    %46 = arith.addf %37, %45 : vector<128x64xf32>
    %c1_i32_33 = arith.constant 1 : i32
    %47 = arith.addi %0, %c1_i32_33 : i32
    %c0_34 = arith.constant 0 : index
    %48 = arith.index_cast %47 : i32 to index
    %c2_35 = arith.constant 2 : index
    %c0_36 = arith.constant 0 : index
    %49 = vector.load %arg2[%c0_34, %48, %c2_35, %c0_36] : memref<1x18x18x3xbf16, #tpu.memory_space<vmem>>, vector<1x8x16x3xbf16>
    %50 = vector.shape_cast %49 : vector<1x8x16x3xbf16> to vector<8x16x3xbf16>
    %51 = vector.shape_cast %50 : vector<8x16x3xbf16> to vector<128x3xbf16>
    %c5 = arith.constant 5 : index
    %c0_37 = arith.constant 0 : index
    %c0_38 = arith.constant 0 : index
    %52 = vector.load %arg3[%c5, %c0_37, %c0_38] : memref<9x3x64xbf16, #tpu.memory_space<vmem>>, vector<1x3x64xbf16>
    %53 = vector.shape_cast %52 : vector<1x3x64xbf16> to vector<3x64xbf16>
    %cst_39 = arith.constant dense<0.000000e+00> : vector<128x64xf32>
    %54 = tpu.matmul %51, %53, %cst_39 {dimension_numbers = #tpu.dot_dimension_numbers<[1], [0], [0], [1], [0, 0, 1, 1], [], []>} : vector<128x3xbf16>, vector<3x64xbf16>, vector<128x64xf32> -> vector<128x64xf32>
    %55 = arith.addf %46, %54 : vector<128x64xf32>
    %c2_i32 = arith.constant 2 : i32
    %56 = arith.addi %0, %c2_i32 : i32
    %c0_40 = arith.constant 0 : index
    %57 = arith.index_cast %56 : i32 to index
    %c0_41 = arith.constant 0 : index
    %c0_42 = arith.constant 0 : index
    %58 = vector.load %arg2[%c0_40, %57, %c0_41, %c0_42] : memref<1x18x18x3xbf16, #tpu.memory_space<vmem>>, vector<1x8x16x3xbf16>
    %59 = vector.shape_cast %58 : vector<1x8x16x3xbf16> to vector<8x16x3xbf16>
    %60 = vector.shape_cast %59 : vector<8x16x3xbf16> to vector<128x3xbf16>
    %c6 = arith.constant 6 : index
    %c0_43 = arith.constant 0 : index
    %c0_44 = arith.constant 0 : index
    %61 = vector.load %arg3[%c6, %c0_43, %c0_44] : memref<9x3x64xbf16, #tpu.memory_space<vmem>>, vector<1x3x64xbf16>
    %62 = vector.shape_cast %61 : vector<1x3x64xbf16> to vector<3x64xbf16>
    %cst_45 = arith.constant dense<0.000000e+00> : vector<128x64xf32>
    %63 = tpu.matmul %60, %62, %cst_45 {dimension_numbers = #tpu.dot_dimension_numbers<[1], [0], [0], [1], [0, 0, 1, 1], [], []>} : vector<128x3xbf16>, vector<3x64xbf16>, vector<128x64xf32> -> vector<128x64xf32>
    %64 = arith.addf %55, %63 : vector<128x64xf32>
    %c2_i32_46 = arith.constant 2 : i32
    %65 = arith.addi %0, %c2_i32_46 : i32
    %c0_47 = arith.constant 0 : index
    %66 = arith.index_cast %65 : i32 to index
    %c1_48 = arith.constant 1 : index
    %c0_49 = arith.constant 0 : index
    %67 = vector.load %arg2[%c0_47, %66, %c1_48, %c0_49] : memref<1x18x18x3xbf16, #tpu.memory_space<vmem>>, vector<1x8x16x3xbf16>
    %68 = vector.shape_cast %67 : vector<1x8x16x3xbf16> to vector<8x16x3xbf16>
    %69 = vector.shape_cast %68 : vector<8x16x3xbf16> to vector<128x3xbf16>
    %c7 = arith.constant 7 : index
    %c0_50 = arith.constant 0 : index
    %c0_51 = arith.constant 0 : index
    %70 = vector.load %arg3[%c7, %c0_50, %c0_51] : memref<9x3x64xbf16, #tpu.memory_space<vmem>>, vector<1x3x64xbf16>
    %71 = vector.shape_cast %70 : vector<1x3x64xbf16> to vector<3x64xbf16>
    %cst_52 = arith.constant dense<0.000000e+00> : vector<128x64xf32>
    %72 = tpu.matmul %69, %71, %cst_52 {dimension_numbers = #tpu.dot_dimension_numbers<[1], [0], [0], [1], [0, 0, 1, 1], [], []>} : vector<128x3xbf16>, vector<3x64xbf16>, vector<128x64xf32> -> vector<128x64xf32>
    %73 = arith.addf %64, %72 : vector<128x64xf32>
    %c2_i32_53 = arith.constant 2 : i32
    %74 = arith.addi %0, %c2_i32_53 : i32
    %c0_54 = arith.constant 0 : index
    %75 = arith.index_cast %74 : i32 to index
    %c2_55 = arith.constant 2 : index
    %c0_56 = arith.constant 0 : index
    %76 = vector.load %arg2[%c0_54, %75, %c2_55, %c0_56] : memref<1x18x18x3xbf16, #tpu.memory_space<vmem>>, vector<1x8x16x3xbf16>
    %77 = vector.shape_cast %76 : vector<1x8x16x3xbf16> to vector<8x16x3xbf16>
    %78 = vector.shape_cast %77 : vector<8x16x3xbf16> to vector<128x3xbf16>
    %c8 = arith.constant 8 : index
    %c0_57 = arith.constant 0 : index
    %c0_58 = arith.constant 0 : index
    %79 = vector.load %arg3[%c8, %c0_57, %c0_58] : memref<9x3x64xbf16, #tpu.memory_space<vmem>>, vector<1x3x64xbf16>
    %80 = vector.shape_cast %79 : vector<1x3x64xbf16> to vector<3x64xbf16>
    %cst_59 = arith.constant dense<0.000000e+00> : vector<128x64xf32>
    %81 = tpu.matmul %78, %80, %cst_59 {dimension_numbers = #tpu.dot_dimension_numbers<[1], [0], [0], [1], [0, 0, 1, 1], [], []>} : vector<128x3xbf16>, vector<3x64xbf16>, vector<128x64xf32> -> vector<128x64xf32>
    %82 = arith.addf %73, %81 : vector<128x64xf32>
    %c0_60 = arith.constant 0 : index
    %c0_61 = arith.constant 0 : index
    %83 = vector.load %arg4[%c0_60, %c0_61] : memref<1x64xf32, #tpu.memory_space<vmem>>, vector<1x64xf32>
    %84 = vector.broadcast %83 : vector<1x64xf32> to vector<128x64xf32>
    %85 = arith.addf %82, %84 : vector<128x64xf32>
    %cst_62 = arith.constant 0.000000e+00 : f32
    %86 = vector.broadcast %cst_62 : f32 to vector<128x64xf32>
    %87 = arith.maximumf %85, %86 : vector<128x64xf32>
    %88 = vector.shape_cast %87 : vector<128x64xf32> to vector<8x16x64xf32>
    %89 = arith.truncf %88 : vector<8x16x64xf32> to vector<8x16x64xbf16>
    %c0_63 = arith.constant 0 : index
    %c0_64 = arith.constant 0 : index
    %c0_65 = arith.constant 0 : index
    %c0_66 = arith.constant 0 : index
    %90 = vector.load %arg5[%c0_63, %c0_64, %c0_65, %c0_66] : memref<1x8x16x64xbf16, #tpu.memory_space<vmem>>, vector<1x8x16x64xbf16>
    %91 = vector.shape_cast %90 : vector<1x8x16x64xbf16> to vector<8x16x64xbf16>
    %92 = vector.shape_cast %89 : vector<8x16x64xbf16> to vector<1x8x16x64xbf16>
    tpu.vector_store %arg5[%c0_63, %c0_64, %c0_65, %c0_66], %92 {strides = array<i32>} : memref<1x8x16x64xbf16, #tpu.memory_space<vmem>>, vector<1x8x16x64xbf16>,
    return
  }
  func.func @transform_0(%arg0: i32, %arg1: i32) -> (i32, i32, i32, i32) {
    %c0_i32 = arith.constant 0 : i32
    %c0_i32_0 = arith.constant 0 : i32
    %c0_i32_1 = arith.constant 0 : i32
    %c0_i32_2 = arith.constant 0 : i32
    return %arg0, %c0_i32, %c0_i32_0, %c0_i32_1 : i32, i32, i32, i32
  }
  func.func @transform_1(%arg0: i32, %arg1: i32) -> (i32, i32, i32) {
    %c0_i32 = arith.constant 0 : i32
    %c0_i32_0 = arith.constant 0 : i32
    %c0_i32_1 = arith.constant 0 : i32
    %c0_i32_2 = arith.constant 0 : i32
    return %c0_i32, %c0_i32_0, %c0_i32_1 : i32, i32, i32
  }
  func.func @transform_2(%arg0: i32, %arg1: i32) -> (i32, i32) {
    %c0_i32 = arith.constant 0 : i32
    %c0_i32_0 = arith.constant 0 : i32
    %c0_i32_1 = arith.constant 0 : i32
    return %c0_i32, %c0_i32_0 : i32, i32
  }
  func.func @transform_3(%arg0: i32, %arg1: i32) -> (i32, i32, i32, i32) {
    %c0_i32 = arith.constant 0 : i32
    %c0_i32_0 = arith.constant 0 : i32
    %c0_i32_1 = arith.constant 0 : i32
    return %arg0, %arg1, %c0_i32, %c0_i32_0 : i32, i32, i32, i32
  }
}

</mosaic_0001>

<bundles_post_ra>
// kernel: tpu_custom_call.1
= control target key start
LH: loop header
LB: loop body
LE: loop exit
PB: predicated region body
PF: predicated region fallthrough
CT: control target
= control target key end

     0   :  { %8 = vsyncpa [#allocation3], 0  ;;  %s4842_s0 = inlined_call_operand.vmem [shape: bf16[2,18,18,3], index: 0, kind: input, shape index: {}]   ;;  %s4843_s1 = inlined_call_operand.vmem [shape: bf16[9,3,64], index: 1, kind: input, shape index: {}]   ;;  %s4844_s2 = inlined_call_operand.vmem [shape: f32[1,64], index: 2, kind: input, shape index: {}]   ;;  %s4845_s3 = inlined_call_operand.hbm [shape: bf16[2,16,16,64], index: 3, kind: output, shape index: {}]  }
   0x1   :  { %10 = vsyncpa [#allocation3 + $0x1], 0  ;;  %s3796_s12 = smov 0   ;;  %s3798_s13 = smov 0  }
   0x2   :  { %s3800_s14 = smov 0   ;;  %s3802_s15 = smov 0  }
   0x3   :  { %s3804_s16 = smov 0   ;;  %s3806_s17 = smov 0  }
   0x4   :  { %s3808_s18 = smov 0   ;;  %s3810_s19 = smov 0  }
   0x5 LB: > { %s2876_s20 = sadd.s32 4294967295, %s3770_s19   ;;  %s2877_s21 = sadd.s32 4294967294, %s3770_s19   ;;  %s3770_s19 = sphi %s3810_s19, %s16_s19   ;;  %s3766_s18 = sphi %s3808_s18, %s4876_s18   ;;  %s3762_s17 = sphi %s3806_s17, %s4875_s17   ;;  %s3758_s16 = sphi %s3804_s16, %s4874_s16   ;;  %s3754_s15 = sphi %s3802_s15, %s4873_s15   ;;  %s3750_s14 = sphi %s3800_s14, %s4872_s14   ;;  %s3746_s13 = sphi %s3798_s13, %s4871_s13   ;;  %s3742_s12 = sphi %s3796_s12, %s4870_s12  }
   0x6   : > { %s25_s22 = sadd.s32 1, %s3762_s17  ;;  %s28_s23 = sadd.s32 1, %s3766_s18 }
   0x7   : > { %p26_p0 = scmp.ge.s32.totalorder %s25_s22, 2  ;;  %p115_p1 = scmp.ne.s32.totalorder %s3750_s14, %s3746_s13 }
   0x8   : > { %p116_p2 = scmp.eq.s32.totalorder %s2876_s20, 3  ;;  %p121_p5 = scmp.ne.s32.totalorder %s3746_s13, %s3742_s12 }
   0x9   : > { %s4878_s22 = smov (%p26_p0, %s25_s22), 0  ;;  %s4880_s23 = smov (!%p26_p0, %s28_s23), %s3766_s18 }
   0xa   : > { %s101_s24 = ssub.s32 %s3762_s17, %s4878_s22  ;;  %p3847_p3 = por %p116_p2, %p115_p1 }
   0xb   : > { %p30_p4 = scmp.ge.s32.totalorder %s4880_s23, 2  ;;  %p122_p6 = scmp.eq.s32.totalorder %s2877_s21, 3 }
   0xc   : > { %p2880_p7 = scmp.ge.s32.totalorder %s3770_s19, 1  ;;  %p154_p9 = scmp.lt.s32.totalorder %s3770_s19, 5 }
   0xd   : > { %s4882_s23 = smov (%p30_p4, %s4880_s23), 0  ;;  %p3856_p8 = por %p122_p6, %p121_p5 }
   0xe   : > { %s100_s27 = ssub.s32 %s3766_s18, %s4882_s23  ;;  %s105_s28 = sadd.s32 1, %s3750_s14 }
   0xf   : > { %s102_s29 = sor.u32 %s101_s24, %s100_s27  ;;  %p155_p10 = pnand %p2880_p7, %p154_p9 }
  0x10   : > { %p103_p11 = scmp.eq.s32.totalorder %s102_s29, 0 }
  0x11   : > { %158 = sbr.rel (%p155_p10) target bundleno = 446 (0x1be), region = 32 }
  0x12   : > { %s3865_s30 = scalar_select %p103_p11, %s3750_s14, %s105_s28  }
  0x18   : > { %v2886_v0 = vld [vmem:[%s4843_s1 + $0x2] sm:$0x3]  ;;  %vm460_vm0 = vcmask 1040384   ;;  %vm461_vm1 = vcmask 1041408   ;;  %p178_p12 = scmp.lt.s32.totalorder %s3758_s16, 1  ;;  %v3772_v1 = vmov 65535  }
  0x19   : > { %v462_v2 = vsel %vm460_vm0, 4294967295, %v3772_v1  ;;  %v3003_v3 = vld [vmem:[%s4843_s1 + $0x8] sm:$0x3]  ;;  %s3186_s9 = smul.u32 96, %s3754_s15  ;;  %v205_v7 = vld [vmem:[%s4843_s1] sm:$0x3] }
  0x1a   : > { %v3874_v4 = vsel %vm461_vm1, %v462_v2, 0  ;;  %s179_s8 = scalar_select %p178_p12, %s3758_s16, 1  ;;  %v3036_v8 = vld [vmem:[%s4843_s1 + $0xa] sm:$0x3]  ;;  %vm214_vm2 = vsmask.f32 3328 }
  0x1b   : > { %v465_v5 = vand.u32 %v2886_v0, %v3874_v4  ;;  %v3879_v6 = vand.u32 %v3003_v3, %v3874_v4  ;;  %v3889_v9 = vand.u32 %v3874_v4, %v205_v7  ;;  %v3892_v10 = vand.u32 %v3036_v8, %v3874_v4  ;;  %v3071_v11 = vld [vmem:[%s4843_s1 + $0xc] sm:$0x3]  ;;  %v2927_v28 = vld [vmem:[%s4843_s1 + $0x4] sm:$0x3]  ;;  %v3112_v33 = vld [vmem:[%s4843_s1 + $0xe] sm:$0x3] }
  0x1c   : > { %s3577_s24 = smul.u32 216, %s179_s8  ;;  %vm215_vm3 = vsmask.f32 7440  ;;  %vm435_vm4 = vcmask 23552   ;;  %v3928_v23 = vand.u32 %v3071_v11, %v3874_v4  ;;  %v3952_v44 = vand.u32 %v2927_v28, %v3874_v4  ;;  %s175_s27 = sand.u32 1, %s3746_s13  }
  0x1d   : > { %3285 = vmatprep.subr.bf16.mxu1 %v465_v5  ;;  %3357 = vmatprep.subr.bf16.mxu0 %v3879_v6  ;;  %vm3944_vm5 = vmor %vm214_vm2, %vm215_vm3  ;;  %v3955_v48 = vand.u32 %v3112_v33, %v3874_v4  ;;  %vm752_vm6 = vcmask 1042432   ;;  %vm753_vm7 = vcmask 1046532   ;;  %v4724_v39 = vld [vmem:[%s4844_s2] ss:$0 sm:$0xff]  ;;  %vm2756_vm9 = vcmask 519168   ;;  %s3203_s6 = sshll.u32 %s3754_s15, 4 }
  0x1e   : > { %3286 = vmatpush3.bf16.msra.mxu1 %v465_v5  ;;  %3358 = vmatpush3.bf16.msra.mxu0 %v3879_v6  ;;  %s182_s29 = scalar_lea.vmem %s4842_s0, %s3577_s24  ;;  %vm4091_vm8 = vmor %vm752_vm6, %vm753_vm7  ;;  %s3182_s7 = sshll.u32 %s3758_s16, 5 }
  0x1f   : > { %s3899_s4 = scalar_lea.vmem %s182_s29, %s3186_s9  ;;  %3303 = vmatprep.subr.bf16.mxu1 %v3889_v9  ;;  %3375 = vmatprep.subr.bf16.mxu0 %v3892_v10  ;;  %s2787_s15 = sadd.s32 %s3203_s6, %s3182_s7 }
  0x20   : > { %v3907_v12 = vld [vmem:[%s3899_s4] sm:$0xf]  ;;  %v3910_v13 = vld [vmem:[%s3899_s4 + $0x4] sm:$0xf]  ;;  %v3913_v14 = vld [vmem:[%s3899_s4 + $0x8] sm:$0x1] }
  0x21   : > { %v218_v15 = vshrl.u32 %v3907_v12, 16  ;;  %v221_v16 = vshll.u32 %v3907_v12, 16  ;;  %v227_v17 = vshll.u32 %v3910_v13, 16  ;;  %v231_v18 = vshrl.u32 %v3910_v13, 16  ;;  %v2979_v19 = vld [vmem:[%s3899_s4 + $0xc] sm:$0xf] }
  0x22   : > { %v237_v20 = vshll.u32 %v3913_v14, 16  ;;  %v3922_v21 = vld [vmem:[%s3899_s4 + $0x10] sm:$0xf]  ;;  %v3925_v22 = vld [vmem:[%s3899_s4 + $0x14] sm:$0x1]  ;;  %v1204_v30 = vshrl.u32 %v2979_v19, 16 }
  0x23   : > { %v220_v24 = vrot.slane %v218_v15, 4  ;;  %v223_v25 = vrot.slane %v221_v16, 5  ;;  %v229_v26 = vrot.slane %v227_v17, 5  ;;  %v233_v27 = vrot.slane %v231_v18, 4  ;;  %v3940_v38 = vld [vmem:[%s3899_s4 + $0xc] sm:$0xf] }
  0x24   : > { %v239_v29 = vrot.slane %v237_v20, 5  ;;  %v1207_v31 = vshll.u32 %v2979_v19, 16  ;;  %v1213_v32 = vshll.u32 %v3922_v21, 16  ;;  %v1217_v36 = vshrl.u32 %v3922_v21, 16  ;;  %v3949_v43 = vld [vmem:[%s3899_s4 + $0x10] sm:$0xf] }
  0x25   : > { %v224_v34 = vor.u32 %v223_v25, %v220_v24  ;;  %v234_v35 = vor.u32 %v233_v27, %v229_v26  ;;  %v1223_v37 = vshll.u32 %v3925_v22, 16  ;;  %v1206_v40 = vrot.slane %v1204_v30, 4  ;;  %v3958_v51 = vld [vmem:[%s3899_s4 + $0x14] sm:$0x1]  ;;  %v2982_v62 = vld [vmem:[%s3899_s4 + $0x18] sm:$0xf] }
  0x26   : > { %v1209_v41 = vrot.slane %v1207_v31, 5  ;;  %v1215_v42 = vrot.slane %v1213_v32, 5  ;;  %v1219_v47 = vrot.slane %v1217_v36, 4  ;;  %v242_v52 = vshrl.u32 %v3940_v38, 16  ;;  %v3971_v3 = vld [vmem:[%s3899_s4 + $0x1c] sm:$0xf] }
  0x27   : > { %v225_v45 = vrot.slane %v224_v34, 4  ;;  %v235_v46 = vrot.slane %v234_v35, 4  ;;  %v1225_v50 = vrot.slane %v1223_v37, 5  ;;  %v245_v53 = vshll.u32 %v3940_v38, 16  ;;  %v3979_v15 = vld [vmem:[%s3899_s4 + $0x20] sm:$0x1] }
  0x28   : > { %v1210_v49 = vor.u32 %v1209_v41, %v1206_v40  ;;  %v1220_v56 = vor.u32 %v1219_v47, %v1215_v42  ;;  %v251_v57 = vshll.u32 %v3949_v43, 16  ;;  %v244_v60 = vrot.slane %v242_v52, 4  ;;  %v3987_v31 = vld [vmem:[%s3899_s4 + $0x18] sm:$0xf]  ;;  %v3994_v36 = vld [vmem:[%s3899_s4 + $0x1c] sm:$0xf] }
  0x29   : > { %v230_v54 = vsel %vm3944_vm5, %v225_v45, %v229_v26  ;;  %v240_v55 = vsel %vm3944_vm5, %v235_v46, %v239_v29  ;;  %v247_v61 = vrot.slane %v245_v53, 5  ;;  %v255_v1 = vshrl.u32 %v3949_v43, 16  ;;  %v4002_v47 = vld [vmem:[%s3899_s4 + $0x20] sm:$0x1]  ;;  %s3183_s16 = sshll.u32 %s2787_s15, 6  ;;  %s4790_s20 = scalar_lea.sflag [#allocation3], %s175_s27 }
  0x2a   : > { %v2887_v58 = vcombine.low %v230_v54, %v240_v55  ;;  %v1211_v59 = vrot.slane %v1210_v49, 4  ;;  %v1221_v63 = vrot.slane %v1220_v56, 4  ;;  %v253_v0 = vrot.slane %v251_v57, 5  ;;  %v2985_v56 = vld [vmem:[%s3899_s4 + $0x24] sm:$0xf]  ;;  %s4778_s11 = scalar_lea.hbm %s4845_s3, %s3183_s16  ;;  %s3773_s24 = smov [#allocation2]  }
  0x2b   : > { %v261_v2 = vshll.u32 %v3958_v51, 16  ;;  %v1595_v7 = vrot.slane %v3922_v21, 5  ;;  %v1598_v8 = vrot.slane %v3925_v22, 5  ;;  %v248_v11 = vor.u32 %v247_v61, %v244_v60  ;;  %v4012_v61 = vld [vmem:[%s3899_s4 + $0x28] sm:$0xf]  ;;  %s3680_s28 = sshll.u32 %s3773_s24, 4  ;;  %s3681_s28 = int_to_ptr.vmem [resolvable:$false] %s3680_s28 }
  0x2c   : > { %3287 = vmatprep.mubr.msk.bf16.mxu1 %vm435_vm4, %v2887_v58  ;;  %v1216_v5 = vsel %vm3944_vm5, %v1211_v59, %v1215_v42  ;;  %v1226_v16 = vsel %vm3944_vm5, %v1221_v63, %v1225_v50  ;;  %v257_v17 = vrot.slane %v255_v1, 4  ;;  %v1228_v19 = vshrl.u32 %v2982_v62, 16  ;;  %s3682_s29 = scalar_lea.vmem %s3681_s28, 2048 }
  0x2d   : > { %v263_v18 = vrot.slane %v261_v2, 5  ;;  %v3004_v20 = vcombine.low %v1216_v5, %v1226_v16  ;;  %v249_v24 = vrot.slane %v248_v11, 4  ;;  %v1231_v25 = vshll.u32 %v2982_v62, 16  ;;  %v4019_v11 = vld [vmem:[%s3899_s4 + $0x2c] sm:$0x1] }
  0x2e   : > { %v1237_v26 = vshll.u32 %v3971_v3, 16  ;;  %v258_v27 = vor.u32 %v257_v17, %v253_v0  ;;  %v1230_v28 = vrot.slane %v1228_v19, 4  ;;  %v1241_v29 = vshrl.u32 %v3971_v3, 16 }
  0x2f   : > { %v1247_v30 = vshll.u32 %v3979_v15, 16  ;;  %3359 = vmatprep.mubr.msk.bf16.mxu0 %vm435_vm4, %v3004_v20  ;;  %v254_v32 = vsel %vm3944_vm5, %v249_v24, %v253_v0  ;;  %v1233_v33 = vrot.slane %v1231_v25, 5  ;;  %v1602_v35 = vrot.slane %v3971_v3, 5  ;;  %v4026_v25 = vld [vmem:[%s3899_s4 + $0x24] sm:$0xf] }
  0x30   : > { %v1239_v34 = vrot.slane %v1237_v26, 5  ;;  %v259_v37 = vrot.slane %v258_v27, 4  ;;  %v1243_v40 = vrot.slane %v1241_v29, 4  ;;  %v1605_v42 = vrot.slane %v3979_v15, 5 }
  0x31   : > { %v1249_v41 = vrot.slane %v1247_v30, 5  ;;  %v1234_v45 = vor.u32 %v1233_v33, %v1230_v28  ;;  %v3999_v46 = vrot.slane %v1602_v35, 4  ;;  %v266_v49 = vshrl.u32 %v3987_v31, 16  ;;  %v4029_v30 = vld [vmem:[%s3899_s4 + $0x28] sm:$0xf] }
  0x32   : > { %v269_v50 = vshll.u32 %v3987_v31, 16  ;;  %v264_v52 = vsel %vm3944_vm5, %v259_v37, %v263_v18  ;;  %v1244_v53 = vor.u32 %v1243_v40, %v1239_v34  ;;  %v275_v54 = vshll.u32 %v3994_v36, 16 }
  0x33   : > { %v279_v55 = vshrl.u32 %v3994_v36, 16  ;;  %v2888_v57 = vcombine.low %v254_v32, %v264_v52  ;;  %v1235_v58 = vrot.slane %v1234_v45, 4  ;;  %v268_v59 = vrot.slane %v266_v49, 4 }
  0x34   : > { %v271_v60 = vrot.slane %v269_v50, 5  ;;  %v1245_v62 = vrot.slane %v1244_v53, 4  ;;  %v277_v63 = vrot.slane %v275_v54, 5  ;;  %v285_v1 = vshll.u32 %v4002_v47, 16 }
  0x35   : > { %v281_v0 = vrot.slane %v279_v55, 4  ;;  %3288 = vmatmul.mubr.msk.bf16.vlgmr.msra.gmra.mrb[0].mxu1 %vm435_vm4, %v2888_v57  ;;  %v1240_v2 = vsel %vm3944_vm5, %v1235_v58, %v1239_v34  ;;  %v1252_v16 = vshrl.u32 %v2985_v56, 16  ;;  %v1255_v17 = vshll.u32 %v2985_v56, 16  ;;  %v2988_v55 = vld [vmem:[%s3899_s4 + $0x30] sm:$0xf] }
  0x36   : > { %v272_v5 = vor.u32 %v271_v60, %v268_v59  ;;  %3304 = vmatpush3.bf16.msra.mxu1 %v3889_v9  ;;  %v1250_v18 = vsel %vm3944_vm5, %v1245_v62, %v1249_v41  ;;  %v287_v20 = vrot.slane %v285_v1, 5  ;;  %v1261_v24 = vshll.u32 %v4012_v61, 16  ;;  %v4038_v41 = vld [vmem:[%s3899_s4 + $0x2c] sm:$0x1]  ;;  %v4048_v60 = vld [vmem:[%s3899_s4 + $0x34] sm:$0xf] }
  0x37   : > { %v282_v19 = vor.u32 %v281_v0, %v277_v63  ;;  %v3005_v26 = vcombine.low %v1240_v2, %v1250_v18  ;;  %v1254_v28 = vrot.slane %v1252_v16, 4  ;;  %v1257_v29 = vrot.slane %v1255_v17, 5  ;;  %3321 = vmatprep.subr.bf16.mxu1 %v3952_v44 }
  0x38   : > { %v273_v27 = vrot.slane %v272_v5, 4  ;;  %v1263_v32 = vrot.slane %v1261_v24, 5  ;;  %v1265_v33 = vshrl.u32 %v4012_v61, 16  ;;  %v1271_v34 = vshll.u32 %v4019_v11, 16  ;;  %v4057_v5 = vld [vmem:[%s3899_s4 + $0x38] sm:$0x1] }
  0x39   : > { %v283_v9 = vrot.slane %v282_v19, 4  ;;  %3360 = vmatmul.mubr.msk.bf16.vlgmr.msra.gmra.mrb[0].mxu0 %vm435_vm4, %v3005_v26  ;;  %v1258_v40 = vor.u32 %v1257_v29, %v1254_v28  ;;  %v290_v45 = vshrl.u32 %v4026_v25, 16  ;;  %v293_v49 = vshll.u32 %v4026_v25, 16 }
  0x3a   : > { %v278_v37 = vsel %vm3944_vm5, %v273_v27, %v277_v63  ;;  %3376 = vmatpush3.bf16.msra.mxu0 %v3892_v10  ;;  %v1267_v52 = vrot.slane %v1265_v33, 4  ;;  %v1273_v53 = vrot.slane %v1271_v34, 5  ;;  %v299_v54 = vshll.u32 %v4029_v30, 16 }
  0x3b   : > { %v288_v50 = vsel %vm3944_vm5, %v283_v9, %v287_v20  ;;  %v1259_v57 = vrot.slane %v1258_v40, 4  ;;  %v292_v58 = vrot.slane %v290_v45, 4  ;;  %v295_v59 = vrot.slane %v293_v49, 5  ;;  %3393 = vmatprep.subr.bf16.mxu0 %v3928_v23  ;;  %v4062_v9 = vld [vmem:[%s3899_s4 + $0x30] sm:$0xf] }
  0x3c   : > { %v2889_v56 = vcombine.low %v278_v37, %v288_v50  ;;  %v1268_v10 = vor.u32 %v1267_v52, %v1263_v32  ;;  %v301_v62 = vrot.slane %v299_v54, 5  ;;  %v303_v63 = vshrl.u32 %v4029_v30, 16  ;;  %v4068_v40 = vld [vmem:[%s3899_s4 + $0x34] sm:$0xf]  ;;  %v4073_v54 = vld [vmem:[%s3899_s4 + $0x38] sm:$0x1] }
  0x3d   : > { %v309_v0 = vshll.u32 %v4038_v41, 16  ;;  %v1264_v1 = vsel %vm3944_vm5, %v1259_v57, %v1263_v32  ;;  %v296_v2 = vor.u32 %v295_v59, %v292_v58  ;;  %v1276_v16 = vshrl.u32 %v2988_v55, 16 }
  0x3e   : > { %3291 = vmatprep.mubr.msk.bf16.mxu1 %vm435_vm4, %v2889_v56  ;;  %v1279_v17 = vshll.u32 %v2988_v55, 16  ;;  %v1269_v18 = vrot.slane %v1268_v10, 4  ;;  %v305_v19 = vrot.slane %v303_v63, 4  ;;  %v1285_v24 = vshll.u32 %v4048_v60, 16  ;;  %v3020_v63 = vld [vmem:[%s3899_s4 + $0xc] sm:$0xe] }
  0x3f   : > { %v311_v20 = vrot.slane %v309_v0, 5  ;;  %v297_v26 = vrot.slane %v296_v2, 4  ;;  %v1278_v27 = vrot.slane %v1276_v16, 4  ;;  %v1289_v29 = vshrl.u32 %v4048_v60, 16 }
  0x40   : > { %v1281_v28 = vrot.slane %v1279_v17, 5  ;;  %v1274_v32 = vsel %vm3944_vm5, %v1269_v18, %v1273_v53  ;;  %v306_v33 = vor.u32 %v305_v19, %v301_v62  ;;  %v1287_v34 = vrot.slane %v1285_v24, 5  ;;  %v4085_v17 = vld [vmem:[%s3899_s4 + $0x3c] sm:$0xf] }
  0x41   : > { %v1295_v37 = vshll.u32 %v4057_v5, 16  ;;  %v3006_v45 = vcombine.low %v1264_v1, %v1274_v32  ;;  %v302_v49 = vsel %vm3944_vm5, %v297_v26, %v301_v62  ;;  %v1291_v52 = vrot.slane %v1289_v29, 4 }
  0x42   : > { %v1282_v50 = vor.u32 %v1281_v28, %v1278_v27  ;;  %v307_v55 = vrot.slane %v306_v33, 4  ;;  %v314_v53 = vshrl.u32 %v4062_v9, 16  ;;  %v317_v57 = vshll.u32 %v4062_v9, 16 }
  0x43   : > { %v1297_v56 = vrot.slane %v1295_v37, 5  ;;  %3363 = vmatprep.mubr.msk.bf16.mxu0 %vm435_vm4, %v3006_v45  ;;  %v1292_v59 = vor.u32 %v1291_v52, %v1287_v34  ;;  %v323_v10 = vshll.u32 %v4068_v40, 16  ;;  %v327_v62 = vshrl.u32 %v4068_v40, 16  ;;  %v4099_v37 = vld [vmem:[%s3899_s4 + $0x44] sm:$0x1] }
  0x44   : > { %v1283_v58 = vrot.slane %v1282_v50, 4  ;;  %v312_v0 = vsel %vm3944_vm5, %v307_v55, %v311_v20  ;;  %v316_v1 = vrot.slane %v314_v53, 4  ;;  %v319_v2 = vrot.slane %v317_v57, 5  ;;  %v4096_v20 = vld [vmem:[%s3899_s4 + $0x40] sm:$0xf] }
  0x45   : > { %v333_v16 = vshll.u32 %v4073_v54, 16  ;;  %v2890_v18 = vcombine.low %v302_v49, %v312_v0  ;;  %v1293_v24 = vrot.slane %v1292_v59, 4  ;;  %v325_v26 = vrot.slane %v323_v10, 5  ;;  %v3021_v45 = vld [vmem:[%s3899_s4 + $0x18] sm:$0xe] }
  0x46   : > { %v1288_v19 = vsel %vm3944_vm5, %v1283_v58, %v1287_v34  ;;  %v320_v28 = vor.u32 %v319_v2, %v316_v1  ;;  %v329_v29 = vrot.slane %v327_v62, 4  ;;  %v3028_v33 = vrot.slane %v3020_v63, 9  ;;  %v4110_v55 = vld [vmem:[%s3899_s4 + $0x48] sm:$0xf] }
  0x47   : > { %v335_v32 = vrot.slane %v333_v16, 5  ;;  %3292 = vmatmul.mubr.msk.bf16.gmra.mrb[4].mxu1 %vm435_vm4, %v2890_v18  ;;  %v1298_v34 = vsel %vm3944_vm5, %v1293_v24, %v1297_v56  ;;  %v1597_v49 = vrot.slane %v1595_v7, 4  ;;  %v338_v50 = vshrl.u32 %v4085_v17, 16 }
  0x48   : > { %v341_v52 = vshll.u32 %v4085_v17, 16  ;;  %v3007_v53 = vcombine.low %v1288_v19, %v1298_v34  ;;  %v321_v57 = vrot.slane %v320_v28, 4  ;;  %v330_v58 = vor.u32 %v329_v29, %v325_v26  ;;  %v4130_v19 = vld [vmem:[%s3899_s4 + $0x50] sm:$0x1] }
  0x49   : > { %v1596_v59 = vsel %vm4091_vm8, %v3028_v33, %v1595_v7  ;;  %v1599_v56 = vsel %vm4091_vm8, %v1597_v49, %v1598_v8  ;;  %v340_v10 = vrot.slane %v338_v50, 4  ;;  %v347_v63 = vshll.u32 %v4096_v20, 16  ;;  %v4126_v7 = vld [vmem:[%s3899_s4 + $0x4c] sm:$0xf] }
  0x4a   : > { %v343_v62 = vrot.slane %v341_v52, 5  ;;  %3364 = vmatmul.mubr.msk.bf16.gmra.mrb[4].mxu0 %vm435_vm4, %v3007_v53  ;;  %v326_v0 = vsel %vm3944_vm5, %v321_v57, %v325_v26  ;;  %v331_v1 = vrot.slane %v330_v58, 4  ;;  %v3037_v21 = vcombine.low %v1596_v59, %v1599_v56  ;;  %v4148_v57 = vld [vmem:[%s3899_s4 + $0x54] sm:$0xf] }
  0x4b   : > { %v351_v2 = vshrl.u32 %v4096_v20, 16  ;;  %v349_v16 = vrot.slane %v347_v63, 5  ;;  %v357_v8 = vshll.u32 %v4099_v37, 16  ;;  %v3029_v18 = vrot.slane %v3021_v45, 9 }
  0x4c   : > { %v344_v22 = vor.u32 %v343_v62, %v340_v10  ;;  %v336_v24 = vsel %vm3944_vm5, %v331_v1, %v335_v32  ;;  %3377 = vmatprep.mubr.msk.bf16.mxu0 %vm435_vm4, %v3037_v21  ;;  %v1606_v28 = vsel %vm4091_vm8, %v3999_v46, %v1605_v42  ;;  %v362_v29 = vshrl.u32 %v4110_v55, 16  ;;  %v3022_v32 = vld [vmem:[%s3899_s4 + $0x24] sm:$0xe]  ;;  %v4159_v21 = vld [vmem:[%s3899_s4 + $0x58] sm:$0xf] }
  0x4d   : > { %v353_v26 = vrot.slane %v351_v2, 4  ;;  %v2891_v33 = vcombine.low %v326_v0, %v336_v24  ;;  %v359_v45 = vrot.slane %v357_v8, 5  ;;  %v1603_v49 = vsel %vm4091_vm8, %v3029_v18, %v1602_v35  ;;  %v4168_v24 = vld [vmem:[%s3899_s4 + $0x5c] sm:$0x1] }
  0x4e   : > { %v345_v34 = vrot.slane %v344_v22, 4  ;;  %v3038_v52 = vcombine.low %v1603_v49, %v1606_v28  ;;  %v364_v53 = vrot.slane %v362_v29, 4  ;;  %v365_v15 = vshll.u32 %v4110_v55, 16 }
  0x4f   : > { %v354_v50 = vor.u32 %v353_v26, %v349_v16  ;;  %3295 = vmatprep.mubr.msk.bf16.mxu1 %vm435_vm4, %v2891_v33  ;;  %v371_v46 = vshll.u32 %v4126_v7, 16  ;;  %v375_v3 = vshrl.u32 %v4126_v7, 16  ;;  %v381_v35 = vshll.u32 %v4130_v19, 16 }
  0x50   : > { %v350_v42 = vsel %vm3944_vm5, %v345_v34, %v349_v16  ;;  %v367_v59 = vrot.slane %v365_v15, 5  ;;  %v3030_v56 = vrot.slane %v3022_v32, 9  ;;  %v1609_v10 = vrot.slane %v4012_v61, 5 }
  0x51   : > { %v355_v58 = vrot.slane %v354_v50, 4  ;;  %v373_v62 = vrot.slane %v371_v46, 5  ;;  %v377_v63 = vrot.slane %v375_v3, 4  ;;  %v383_v0 = vrot.slane %v381_v35, 5  ;;  %v3024_v46 = vld [vmem:[%s3899_s4 + $0x3c] sm:$0xe] }
  0x52   : > { %v1612_v1 = vrot.slane %v4019_v11, 5  ;;  %3378 = vmatmul.mubr.msk.bf16.vlgmr.msra.gmra.mrb[0].mxu0 %vm435_vm4, %v3038_v52  ;;  %v368_v22 = vor.u32 %v367_v59, %v364_v53  ;;  %v1610_v16 = vsel %vm4091_vm8, %v3030_v56, %v1609_v10  ;;  %v1611_v8 = vrot.slane %v1609_v10, 4  ;;  %v4188_v56 = vld [vmem:[%s3899_s4 + $0x40] sm:$0xf]  ;;  %v4191_v10 = vld [vmem:[%s3899_s4 + $0x44] sm:$0x1] }
  0x53   : > { %v360_v2 = vsel %vm3944_vm5, %v355_v58, %v359_v45  ;;  %3394 = vmatpush3.bf16.msra.mxu0 %v3928_v23  ;;  %v378_v61 = vor.u32 %v377_v63, %v373_v62  ;;  %v386_v11 = vshrl.u32 %v4148_v57, 16  ;;  %v389_v26 = vshll.u32 %v4148_v57, 16  ;;  %v3023_v45 = vld [vmem:[%s3899_s4 + $0x30] sm:$0xe] }
  0x54   : > { %v2892_v18 = vcombine.low %v350_v42, %v360_v2  ;;  %v369_v28 = vrot.slane %v368_v22, 4  ;;  %v1613_v29 = vsel %vm4091_vm8, %v1611_v8, %v1612_v1  ;;  %v395_v33 = vshll.u32 %v4159_v21, 16  ;;  %3411 = vmatprep.subr.bf16.mxu0 %v3955_v48 }
  0x55   : > { %v399_v34 = vshrl.u32 %v4159_v21, 16  ;;  %v379_v23 = vrot.slane %v378_v61, 4  ;;  %v3039_v49 = vcombine.low %v1610_v16, %v1613_v29  ;;  %v388_v32 = vrot.slane %v386_v11, 4  ;;  %v4209_v29 = vld [vmem:[%s3899_s4 + $0x50] sm:$0x1] }
  0x56   : > { %3296 = vmatmul.mubr.msk.bf16.gmra.mrb[8].mxu1 %vm435_vm4, %v2892_v18  ;;  %v391_v50 = vrot.slane %v389_v26, 5  ;;  %v374_v52 = vsel %vm3944_vm5, %v369_v28, %v373_v62  ;;  %v397_v53 = vrot.slane %v395_v33, 5  ;;  %v405_v42 = vshll.u32 %v4168_v24, 16  ;;  %v4206_v28 = vld [vmem:[%s3899_s4 + $0x4c] sm:$0xf] }
  0x57   : > { %v401_v15 = vrot.slane %v399_v34, 4  ;;  %v384_v3 = vsel %vm3944_vm5, %v379_v23, %v383_v0  ;;  %3381 = vmatprep.mubr.msk.bf16.mxu0 %vm435_vm4, %v3039_v49  ;;  %v3031_v58 = vrot.slane %v3023_v45, 9  ;;  %v1616_v59 = vrot.slane %v4048_v60, 5  ;;  %v3025_v33 = vld [vmem:[%s3899_s4 + $0x48] sm:$0xe] }
  0x58   : > { %v392_v35 = vor.u32 %v391_v50, %v388_v32  ;;  %v2893_v62 = vcombine.low %v374_v52, %v384_v3  ;;  %v407_v1 = vrot.slane %v405_v42, 5  ;;  %v1619_v2 = vrot.slane %v4057_v5, 5  ;;  %v4217_v50 = vld [vmem:[%s3899_s4 + $0x58] sm:$0xf]  ;;  %v4220_v52 = vld [vmem:[%s3899_s4 + $0x5c] sm:$0x1] }
  0x59   : > { %v402_v63 = vor.u32 %v401_v15, %v397_v53  ;;  %v1617_v0 = vsel %vm4091_vm8, %v3031_v58, %v1616_v59  ;;  %v1618_v16 = vrot.slane %v1616_v59, 4  ;;  %v3032_v8 = vrot.slane %v3024_v46, 9  ;;  %4857 = vst [vmem:[#allocation5_spill] sm:$0xff] %v4220_v52  ;;  %v4233_v58 = vld [vmem:[%s3899_s4 + $0x68] sm:$0x1] }
  0x5a   : > { %v393_v22 = vrot.slane %v392_v35, 4  ;;  %3299 = vmatprep.mubr.msk.bf16.mxu1 %vm435_vm4, %v2893_v62  ;;  %v1623_v18 = vrot.slane %v4188_v56, 5  ;;  %v1626_v61 = vrot.slane %v4191_v10, 5  ;;  %v2903_v26 = vcombine.low %v3907_v12, %v3910_v13  ;;  %v3026_v12 = vld [vmem:[%s3899_s4 + $0x54] sm:$0xe]  ;;  %4859 = vst [vmem:[#allocation7_spill] sm:$0xff] %v4233_v58 }
  0x5b   : > { %v403_v60 = vrot.slane %v402_v63, 4  ;;  %v1620_v5 = vsel %vm4091_vm8, %v1618_v16, %v1619_v2  ;;  %v3033_v15 = vrot.slane %v3025_v33, 9  ;;  %v1630_v42 = vrot.slane %v4206_v28, 5  ;;  %v4230_v35 = vld [vmem:[%s3899_s4 + $0x64] sm:$0xf] }
  0x5c   : > { %v398_v11 = vsel %vm3944_vm5, %v393_v22, %v397_v53  ;;  %v3040_v45 = vcombine.low %v1617_v0, %v1620_v5  ;;  %v1624_v23 = vsel %vm4091_vm8, %v3032_v8, %v1623_v18  ;;  %v1625_v49 = vrot.slane %v1623_v18, 4  ;;  %4858 = vst [vmem:[#allocation6_spill] sm:$0xff] %v4230_v35  ;;  %v3027_v2 = vld [vmem:[%s3899_s4 + $0x60] sm:$0xe]  ;;  %v2962_v16 = vld [vmem:[%s4843_s1 + $0x6] sm:$0x3] }
  0x5d   : > { %v408_v34 = vsel %vm3944_vm5, %v403_v60, %v407_v1  ;;  %v1633_v46 = vrot.slane %v4209_v29, 5  ;;  %v1631_v59 = vsel %vm4091_vm8, %v3033_v15, %v1630_v42  ;;  %v1632_v62 = vrot.slane %v1630_v42, 4 }
  0x5e   : > { %v2894_v32 = vcombine.low %v398_v11, %v408_v34  ;;  %3382 = vmatmul.mubr.msk.bf16.gmra.mrb[4].mxu0 %vm435_vm4, %v3040_v45  ;;  %v1627_v53 = vsel %vm4091_vm8, %v1625_v49, %v1626_v61  ;;  %v3034_v63 = vrot.slane %v3026_v12, 9  ;;  %v1637_v1 = vrot.slane %v4217_v50, 5  ;;  %v729_v34 = vld [vmem:[%s3899_s4 + $0xc] sm:$0xe]  ;;  %v730_v45 = vld [vmem:[%s3899_s4 + $0x18] sm:$0xe] }
  0x5f   : > { %v3041_v3 = vcombine.low %v1624_v23, %v1627_v53  ;;  %v764_v22 = vrot.slane %v3949_v43, 5  ;;  %v1640_v0 = vrot.slane %v4220_v52, 5  ;;  %v1634_v8 = vsel %vm4091_vm8, %v1632_v62, %v1633_v46  ;;  %v4531_v52 = vld [vmem:[%s3899_s4 + $0x70] sm:$0xf] }
  0x60   : > { %3300 = vmatmul.mubr.msk.bf16.gmra.mrb[12].mxu1 %vm435_vm4, %v2894_v32  ;;  %v1638_v60 = vsel %vm4091_vm8, %v3034_v63, %v1637_v1  ;;  %v1639_v18 = vrot.slane %v1637_v1, 4  ;;  %v1644_v61 = vrot.slane %v4230_v35, 5  ;;  %v2904_v11 = vcombine.low %v3940_v38, %v3949_v43  ;;  %v731_v38 = vld [vmem:[%s3899_s4 + $0x24] sm:$0xe] }
  0x61   : > { %3305 = vmatprep.mubr.msk.bf16.mxu1 %vm435_vm4, %v2903_v26  ;;  %3385 = vmatprep.mubr.msk.bf16.mxu0 %vm435_vm4, %v3041_v3  ;;  %v3042_v5 = vcombine.low %v1631_v59, %v1634_v8  ;;  %v3035_v26 = vrot.slane %v3027_v2, 9  ;;  %v1647_v33 = vrot.slane %v4233_v58, 5  ;;  %v767_v23 = vrot.slane %v3958_v51, 5  ;;  %v732_v59 = vld [vmem:[%s3899_s4 + $0x30] sm:$0xe] }
  0x62   : > { %v2905_v49 = vcombine.low %v3987_v31, %v3994_v36  ;;  %v1641_v32 = vsel %vm4091_vm8, %v1639_v18, %v1640_v0  ;;  %v1646_v12 = vrot.slane %v1644_v61, 4  ;;  %v4262_v15 = vand.u32 %v2962_v16, %v3874_v4  ;;  %v3657_v18 = vld [vmem:[%s3899_s4 + $0x18] sm:$0xff]   ;;  %v3109_v58 = vld [vmem:[%s3899_s4 + $0x6c] sm:$0xf] }
  0x63   : > { %v3043_v53 = vcombine.low %v1638_v60, %v1641_v32  ;;  %v2920_v43 = vrot.slane %v729_v34, 9  ;;  %v766_v42 = vrot.slane %v764_v22, 4  ;;  %v2921_v46 = vrot.slane %v730_v45, 9  ;;  %v3145_v32 = vld [vmem:[%s4843_s1 + $0x10] sm:$0x3] }
  0x64   : > { %v1645_v51 = vsel %vm4091_vm8, %v3035_v26, %v1644_v61  ;;  %v1648_v31 = vsel %vm4091_vm8, %v1646_v12, %v1647_v33  ;;  %v771_v3 = vrot.slane %v3994_v36, 5  ;;  %v774_v1 = vrot.slane %v4002_v47, 5 }
  0x65   : > { %v4278_v62 = vsel %vm4091_vm8, %v2920_v43, %v764_v22  ;;  %v4282_v63 = vsel %vm4091_vm8, %v766_v42, %v767_v23  ;;  %v2922_v2 = vrot.slane %v731_v38, 9  ;;  %v3044_v22 = vcombine.low %v1645_v51, %v1648_v31  ;;  %v3088_v23 = vld [vmem:[%s3899_s4 + $0x18] sm:$0xf]  ;;  %v4340_v43 = vld [vmem:[%s3899_s4 + $0x1c] sm:$0xf] }
  0x66   : > { %3386 = vmatmul.mubr.msk.bf16.gmra.mrb[8].mxu0 %vm435_vm4, %v3042_v5  ;;  %v2929_v36 = vcombine.low %v4278_v62, %v4282_v63  ;;  %v773_v0 = vrot.slane %v771_v3, 4  ;;  %v778_v16 = vrot.slane %v4029_v30, 5  ;;  %v781_v8 = vrot.slane %v4038_v41, 5 }
  0x67   : > { %3389 = vmatprep.mubr.msk.bf16.mxu0 %vm435_vm4, %v3043_v53  ;;  %v2923_v60 = vrot.slane %v732_v59, 9  ;;  %v2906_v47 = vcombine.low %v4026_v25, %v4029_v30  ;;  %v788_v5 = vrot.slane %v4073_v54, 5  ;;  %v2907_v26 = vcombine.low %v4062_v9, %v4068_v40  ;;  %v733_v30 = vld [vmem:[%s3899_s4 + $0x3c] sm:$0xe]  ;;  %v728_v9 = vld [vmem:[%s3899_s4] sm:$0xe] }
  0x68   : > { %3306 = vmatmul.mubr.msk.bf16.vlgmr.msra.gmra.mrb[0].mxu1 %vm435_vm4, %v2904_v11  ;;  %v4299_v61 = vsel %vm4091_vm8, %v773_v0, %v774_v1  ;;  %v785_v11 = vrot.slane %v4068_v40, 5  ;;  %v4309_v33 = vsel %vm4091_vm8, %v2922_v2, %v778_v16  ;;  %v780_v25 = vrot.slane %v778_v16, 4  ;;  %v3659_v59 = vld [vmem:[%s3899_s4 + $0x24] sm:$0xff]  }
  0x69   : > { %3322 = vmatpush3.bf16.msra.mxu1 %v3952_v44  ;;  %3309 = vmatprep.mubr.msk.bf16.mxu1 %vm435_vm4, %v2905_v49  ;;  %v4290_v44 = vsel %vm4091_vm8, %v2921_v46, %v771_v3  ;;  %v757_v34 = vrot.slane %v3910_v13, 5  ;;  %v2924_v12 = vrot.slane %v733_v30, 9  ;;  %v760_v53 = vrot.slane %v3913_v14, 5  ;;  %v734_v2 = vld [vmem:[%s3899_s4 + $0x48] sm:$0xe] }
  0x6a   : > { %3339 = vmatprep.subr.bf16.mxu1 %v4262_v15  ;;  %v2930_v41 = vcombine.low %v4290_v44, %v4299_v61  ;;  %v4315_v45 = vsel %vm4091_vm8, %v2923_v60, %v785_v11  ;;  %v787_v54 = vrot.slane %v785_v11, 4  ;;  %v4321_v40 = vsel %vm4091_vm8, %v780_v25, %v781_v8  ;;  %v3661_v60 = vld [vmem:[%s3899_s4 + $0x30] sm:$0xff]   ;;  %v4503_v13 = vld [vmem:[%s3899_s4 + $0x64] sm:$0xf] }
  0x6b   : > { %v2919_v42 = vrot.slane %v728_v9, 9  ;;  %v759_v46 = vrot.slane %v757_v34, 4  ;;  %v792_v51 = vrot.slane %v4096_v20, 5  ;;  %v795_v31 = vrot.slane %v4099_v37, 5  ;;  %4860 = vst [vmem:[#allocation8_spill] sm:$0xff] %v4503_v13 }
  0x6c   : > { %v4330_v49 = vsel %vm4091_vm8, %v787_v54, %v788_v5  ;;  %v2908_v3 = vcombine.low %v4085_v17, %v4096_v20  ;;  %v2042_v14 = vshrl.u32 %v3088_v23, 16  ;;  %v2045_v1 = vshll.u32 %v3088_v23, 16  ;;  %v3091_v54 = vld [vmem:[%s3899_s4 + $0x24] sm:$0xf] }
  0x6d   : > { %v2051_v0 = vshll.u32 %v4340_v43, 16  ;;  %v4352_v16 = vsel %vm4091_vm8, %v2924_v12, %v792_v51  ;;  %v794_v8 = vrot.slane %v792_v51, 4  ;;  %v2909_v37 = vcombine.low %v4110_v55, %v4126_v7  ;;  %v4370_v55 = vld [vmem:[%s3899_s4 + $0x20] sm:$0x1] }
  0x6e   : > { %3390 = vmatmul.mubr.msk.bf16.gmra.mrb[12].mxu0 %vm435_vm4, %v3044_v22  ;;  %v2055_v22 = vshrl.u32 %v4340_v43, 16  ;;  %v4358_v17 = vand.u32 %v3145_v32, %v3874_v4  ;;  %v758_v20 = vsel %vm4091_vm8, %v2919_v42, %v757_v34  ;;  %v2925_v11 = vrot.slane %v734_v2, 9  ;;  %v735_v42 = vld [vmem:[%s3899_s4 + $0x54] sm:$0xe] }
  0x6f   : > { %3395 = vmatprep.mubr.msk.bf16.mxu0 %vm435_vm4, %v3657_v18  ;;  %v4366_v18 = vsel %vm4091_vm8, %v794_v8, %v795_v31  ;;  %v2044_v5 = vrot.slane %v2042_v14, 4  ;;  %v799_v25 = vrot.slane %v4126_v7, 5  ;;  %v4377_v30 = vrot.slane %v2051_v0, 5  ;;  %v4384_v7 = vld [vmem:[%s3899_s4 + $0x28] sm:$0xf] }
  0x70   : > { %3310 = vmatmul.mubr.msk.bf16.gmra.mrb[4].mxu1 %vm435_vm4, %v2906_v47  ;;  %v761_v47 = vsel %vm4091_vm8, %v759_v46, %v760_v53  ;;  %v2057_v34 = vrot.slane %v2055_v22, 4  ;;  %v802_v9 = vrot.slane %v4130_v19, 5  ;;  %v2910_v32 = vcombine.low %v4148_v57, %v4159_v21  ;;  %v3094_v19 = vld [vmem:[%s3899_s4 + $0x30] sm:$0xf]  ;;  %v3663_v46 = vld [vmem:[%s3899_s4 + $0x3c] sm:$0xff]  }
  0x71   : > { %3313 = vmatprep.mubr.msk.bf16.mxu1 %vm435_vm4, %v2907_v26  ;;  %v2047_v26 = vrot.slane %v2045_v1, 5  ;;  %v4388_v23 = vsel %vm4091_vm8, %v2925_v11, %v799_v25  ;;  %v2928_v12 = vcombine.low %v758_v20, %v761_v47  ;;  %v2061_v53 = vshll.u32 %v4370_v55, 16  ;;  %v4402_v14 = vld [vmem:[%s3899_s4 + $0x34] sm:$0xf]  ;;  %v3664_v1 = vld [vmem:[%s3899_s4 + $0x48] sm:$0xff]  }
  0x72   : > { %v2066_v31 = vshrl.u32 %v3091_v54, 16  ;;  %v2058_v57 = vor.u32 %v2057_v34, %v4377_v30  ;;  %v2075_v2 = vshll.u32 %v4384_v7, 16  ;;  %v2079_v0 = vshrl.u32 %v4384_v7, 16 }
  0x73   : > { %v2048_v51 = vor.u32 %v2047_v26, %v2044_v5  ;;  %v2090_v8 = vshrl.u32 %v3094_v19, 16  ;;  %v806_v20 = vrot.slane %v4159_v21, 5  ;;  %v2099_v47 = vshll.u32 %v4402_v14, 16 }
  0x74   : > { %v2103_v11 = vshrl.u32 %v4402_v14, 16  ;;  %v809_v5 = vrot.slane %v4168_v24, 5  ;;  %v2059_v21 = vrot.slane %v2058_v57, 4  ;;  %v3665_v57 = vld [vmem:[%s3899_s4 + $0x54] sm:$0xff]  }
  0x75   : > { %v2049_v26 = vrot.slane %v2048_v51, 4  ;;  %v4432_v51 = vld [vmem:[%s3899_s4 + $0x38] sm:$0x1] }
  0x76   : > { %3396 = vmatmul.mubr.msk.bf16.vlgmr.msra.gmra.mrb[0].mxu0 %vm435_vm4, %v3659_v59 }
  0x77   : > { %3412 = vmatpush3.bf16.msra.mxu0 %v3955_v48  ;;  %3399 = vmatprep.mubr.msk.bf16.mxu0 %vm435_vm4, %v3661_v60  ;;  %v801_v48 = vrot.slane %v799_v25, 4  ;;  %v2926_v60 = vrot.slane %v735_v42, 9  ;;  %v2063_v25 = vrot.slane %v2061_v53, 5  ;;  %v4425_v53 = vld [vmem:[%s3899_s4 + $0x2c] sm:$0x1]  ;;  %v2092_v42 = vrot.slane %v2090_v8, 4 }
  0x78   : > { %3314 = vmatmul.mubr.msk.bf16.gmra.mrb[8].mxu1 %vm435_vm4, %v2908_v3  ;;  %3429 = vmatprep.subr.bf16.mxu0 %v4358_v17  ;;  %v2069_v3 = vshll.u32 %v3091_v54, 16  ;;  %v808_v54 = vrot.slane %v806_v20, 4  ;;  %v2054_v8 = vsel %vm3944_vm5, %v2049_v26, %v4377_v30 }
  0x79   : > { %3317 = vmatprep.mubr.msk.bf16.mxu1 %vm435_vm4, %v2909_v37  ;;  %v4399_v59 = vsel %vm4091_vm8, %v801_v48, %v802_v9  ;;  %v2093_v37 = vshll.u32 %v3094_v19, 16  ;;  %v4417_v34 = vsel %vm4091_vm8, %v2926_v60, %v806_v20  ;;  %v2068_v9 = vrot.slane %v2066_v31, 4 }
  0x7a   : > { %v2071_v24 = vrot.slane %v2069_v3, 5  ;;  %v4421_v48 = vrot.slane %v2075_v2, 5  ;;  %v2081_v19 = vrot.slane %v2079_v0, 4  ;;  %v4434_v31 = vrot.slane %v2099_v47, 5  ;;  %v4441_v2 = vld [vmem:[%s3899_s4 + $0x40] sm:$0xf] }
  0x7b   : > { %v2105_v3 = vrot.slane %v2103_v11, 4  ;;  %v3666_v0 = vld [vmem:[%s3899_s4 + $0x60] sm:$0xff]   ;;  %v2085_v20 = vshll.u32 %v4425_v53, 16  ;;  %v3100_v47 = vld [vmem:[%s3899_s4 + $0x48] sm:$0xf]  ;;  %v2123_v30 = vshll.u32 %v4441_v2, 16 }
  0x7c   : > { %v2072_v60 = vor.u32 %v2071_v24, %v2068_v9  ;;  %v4452_v11 = vld [vmem:[%s3899_s4 + $0x4c] sm:$0xf]  ;;  %v2127_v26 = vshrl.u32 %v4441_v2, 16 }
  0x7d   : > { %v2106_v4 = vor.u32 %v2105_v3, %v4434_v31  ;;  %v2147_v9 = vshll.u32 %v4452_v11, 16  ;;  %v3103_v3 = vld [vmem:[%s3899_s4 + $0x54] sm:$0xf] }
  0x7e   : > { %3400 = vmatmul.mubr.msk.bf16.gmra.mrb[4].mxu0 %vm435_vm4, %v3663_v46  ;;  %v4429_v46 = vsel %vm4091_vm8, %v808_v54, %v809_v5  ;;  %v2082_v5 = vor.u32 %v2081_v19, %v4421_v48  ;;  %v2073_v19 = vrot.slane %v2072_v60, 4  ;;  %v4477_v60 = vrot.slane %v2123_v30, 5 }
  0x7f   : > { %3403 = vmatprep.mubr.msk.bf16.mxu0 %vm435_vm4, %v3664_v1  ;;  %v2109_v1 = vshll.u32 %v4432_v51, 16 }
  0x80   : > { %3318 = vmatmul.mubr.msk.bf16.gmra.mrb[12].mxu1 %vm435_vm4, %v2910_v32  ;;  %v2095_v32 = vrot.slane %v2093_v37, 5  ;;  %v2064_v37 = vsel %vm3944_vm5, %v2059_v21, %v2063_v25  ;;  %v2138_v25 = vshrl.u32 %v3100_v47, 16  ;;  %v2141_v21 = vshll.u32 %v3100_v47, 16 }
  0x81   : > { %3323 = vmatprep.mubr.msk.bf16.mxu1 %vm435_vm4, %v2928_v12  ;;  %v3097_v12 = vld [vmem:[%s3899_s4 + $0x3c] sm:$0xf]  ;;  %v3113_v24 = vcombine.low %v2054_v8, %v2064_v37  ;;  %v2111_v63 = vrot.slane %v2109_v1, 5  ;;  %v2107_v8 = vrot.slane %v2106_v4, 4  ;;  %v2162_v1 = vshrl.u32 %v3103_v3, 16 }
  0x82   : > { %v2096_v54 = vor.u32 %v2095_v32, %v2092_v42  ;;  %v2114_v22 = vshrl.u32 %v3097_v12, 16  ;;  %v2117_v38 = vshll.u32 %v3097_v12, 16  ;;  %v2087_v42 = vrot.slane %v2085_v20, 5 }
  0x83   : > { %v2151_v32 = vshrl.u32 %v4452_v11, 16  ;;  %v2083_v12 = vrot.slane %v2082_v5, 4  ;;  %v2129_v20 = vrot.slane %v2127_v26, 4  ;;  %v2140_v44 = vrot.slane %v2138_v25, 4 }
  0x84   : > { %v2097_v62 = vrot.slane %v2096_v54, 4  ;;  %v2119_v37 = vrot.slane %v2117_v38, 5  ;;  %v2143_v61 = vrot.slane %v2141_v21, 5  ;;  %v2165_v5 = vshll.u32 %v3103_v3, 16  ;;  %v3106_v3 = vld [vmem:[%s3899_s4 + $0x60] sm:$0xf] }
  0x85   : > { %v2153_v47 = vrot.slane %v2151_v32, 4  ;;  %v1333_v54 = vshll.u32 %v4206_v28, 16  ;;  %v2078_v30 = vsel %vm3944_vm5, %v2073_v19, %v4421_v48  ;;  %v2088_v26 = vsel %vm3944_vm5, %v2083_v12, %v2087_v42 }
  0x86   : > { %3404 = vmatmul.mubr.msk.bf16.gmra.mrb[8].mxu0 %vm435_vm4, %v3665_v57  ;;  %v4474_v57 = vld [vmem:[%s3899_s4 + $0x58] sm:$0xf]  ;;  %v2102_v25 = vsel %vm3944_vm5, %v2097_v62, %v4434_v31  ;;  %v2112_v48 = vsel %vm3944_vm5, %v2107_v8, %v2111_v63  ;;  %v2144_v19 = vor.u32 %v2143_v61, %v2140_v44  ;;  %v2164_v12 = vrot.slane %v2162_v1, 4  ;;  %v4522_v8 = vld [vmem:[%s3899_s4 + $0x5c] sm:$0x1] }
  0x87   : > { %3407 = vmatprep.mubr.msk.bf16.mxu0 %vm435_vm4, %v3666_v0  ;;  %v3667_v0 = vld [vmem:[%s3899_s4 + $0x6c] sm:$0xff]   ;;  %v2171_v38 = vshll.u32 %v4474_v57, 16  ;;  %v2175_v4 = vshrl.u32 %v4474_v57, 16  ;;  %v4861_v31 = vcombine.low %v4309_v33, %v4321_v40  ;;  %v4862_v63 = vcombine.low %v4315_v45, %v4330_v49 }
  0x88   : > { %3324 = vmatmul.mubr.msk.bf16.vlgmr.msra.gmra.mrb[0].mxu1 %vm435_vm4, %v2929_v36  ;;  %v2116_v36 = vrot.slane %v2114_v22, 4  ;;  %v4486_v22 = vld [vmem:[%s3899_s4 + $0x50] sm:$0x1]  ;;  %v2189_v33 = vshll.u32 %v3106_v3, 16  ;;  %v2195_v40 = vshll.u32 %v4503_v13, 16  ;;  %v1337_v44 = vshrl.u32 %v4206_v28, 16 }
  0x89   : > { %3340 = vmatpush3.bf16.msra.mxu1 %v4262_v15  ;;  %3327 = vmatprep.mubr.msk.bf16.mxu1 %vm435_vm4, %v2930_v41  ;;  %v4481_v15 = vld [vmem:[%s3899_s4 + $0x44] sm:$0x1]  ;;  %v4483_v41 = vrot.slane %v2147_v9, 5  ;;  %v2130_v9 = vor.u32 %v2129_v20, %v4477_v60  ;;  %v2157_v42 = vshll.u32 %v4486_v22, 16  ;;  %v2186_v20 = vshrl.u32 %v3106_v3, 16 }
  0x8a   : > { %3447 = vmatprep.subr.bf16.mxu1 %v3879_v6  ;;  %v2120_v21 = vor.u32 %v2119_v37, %v2116_v36  ;;  %v2133_v32 = vshll.u32 %v4481_v15, 16  ;;  %v2167_v36 = vrot.slane %v2165_v5, 5  ;;  %v4515_v37 = vrot.slane %v2171_v38, 5 }
  0x8b   : > { %v2154_v62 = vor.u32 %v2153_v47, %v4483_v41  ;;  %v2131_v1 = vrot.slane %v2130_v9, 4  ;;  %v3114_v5 = vcombine.low %v2078_v30, %v2088_v26  ;;  %v3115_v38 = vcombine.low %v2102_v25, %v2112_v48 }
  0x8c   : > { %v2121_v61 = vrot.slane %v2120_v21, 4  ;;  %v2135_v47 = vrot.slane %v2133_v32, 5  ;;  %v2145_v45 = vrot.slane %v2144_v19, 4  ;;  %v2159_v49 = vrot.slane %v2157_v42, 5  ;;  %v4543_v32 = vld [vmem:[%s3899_s4 + $0x68] sm:$0x1] }
  0x8d   : > { %v2181_v3 = vshll.u32 %v4522_v8, 16  ;;  %v2188_v35 = vrot.slane %v2186_v20, 4  ;;  %v4533_v28 = vrot.slane %v2195_v40, 5  ;;  %v4535_v9 = vrot.slane %v1333_v54, 5 }
  0x8e   : > { %3408 = vmatmul.mubr.msk.bf16.gmra.mrb[12].mxu0 %vm435_vm4, %v3667_v0  ;;  %v2177_v0 = vrot.slane %v2175_v4, 4  ;;  %v2155_v4 = vrot.slane %v2154_v62, 4  ;;  %v1339_v30 = vrot.slane %v1337_v44, 4  ;;  %v2126_v26 = vsel %vm3944_vm5, %v2121_v61, %v4477_v60 }
  0x8f   : > { %3413 = vmatprep.mubr.msk.bf16.mxu0 %vm435_vm4, %v3113_v24  ;;  %v2199_v24 = vshrl.u32 %v4503_v13, 16  ;;  %v2191_v13 = vrot.slane %v2189_v33, 5  ;;  %v2136_v25 = vsel %vm3944_vm5, %v2131_v1, %v2135_v47  ;;  %v2210_v48 = vshrl.u32 %v3109_v58, 16  ;;  %v3668_v1 = vld [vmem:[%s3899_s4 + $0xc] sm:$0xff]  }
  0x90   : > { %3328 = vmatmul.mubr.msk.bf16.gmra.mrb[4].mxu1 %vm435_vm4, %v4861_v31  ;;  %v2168_v31 = vor.u32 %v2167_v36, %v2164_v12  ;;  %v2213_v19 = vshll.u32 %v3109_v58, 16  ;;  %v2219_v42 = vshll.u32 %v4531_v52, 16  ;;  %v2223_v12 = vshrl.u32 %v4531_v52, 16 }
  0x91   : > { %3331 = vmatprep.mubr.msk.bf16.mxu1 %vm435_vm4, %v4862_v63  ;;  %v2178_v63 = vor.u32 %v2177_v0, %v4515_v37  ;;  %v2201_v21 = vrot.slane %v2199_v24, 4  ;;  %v4863_v54 = vcombine.low %v4352_v16, %v4366_v18  ;;  %v2150_v60 = vsel %vm3944_vm5, %v2145_v45, %v4483_v41 }
  0x92   : > { %v2160_v62 = vsel %vm3944_vm5, %v2155_v4, %v2159_v49  ;;  %v2169_v36 = vrot.slane %v2168_v31, 4  ;;  %v2183_v58 = vrot.slane %v2181_v3, 5  ;;  %v4864_v0 = vcombine.low %v4388_v23, %v4399_v59  ;;  %v2994_v31 = vld [vmem:[%s3899_s4 + $0x48] sm:$0xf] }
  0x93   : > { %v2179_v16 = vrot.slane %v2178_v63, 4  ;;  %v2202_v18 = vor.u32 %v2201_v21, %v4533_v28  ;;  %v2205_v41 = vshll.u32 %v4543_v32, 16  ;;  %v1340_v20 = vor.u32 %v1339_v30, %v4535_v9  ;;  %v3129_v21 = vld [vmem:[%s3899_s4 + $0x18] sm:$0xe] }
  0x94   : > { %v1343_v33 = vshll.u32 %v4209_v29, 16  ;;  %v3116_v40 = vcombine.low %v2126_v26, %v2136_v25  ;;  %v2212_v24 = vrot.slane %v2210_v48, 4  ;;  %v2215_v23 = vrot.slane %v2213_v19, 5 }
  0x95   : > { %v4567_v59 = vrot.slane %v2219_v42, 5  ;;  %v2225_v44 = vrot.slane %v2223_v12, 4  ;;  %v3117_v61 = vcombine.low %v2150_v60, %v2160_v62  ;;  %v2184_v47 = vsel %vm3944_vm5, %v2179_v16, %v2183_v58 }
  0x96   : > { %3414 = vmatmul.mubr.msk.bf16.vlgmr.msra.gmra.mrb[0].mxu0 %vm435_vm4, %v3114_v5  ;;  %v2203_v5 = vrot.slane %v2202_v18, 4  ;;  %v1341_v45 = vrot.slane %v1340_v20, 4  ;;  %v1345_v49 = vrot.slane %v1343_v33, 5  ;;  %v2433_v4 = vrot.slane %v4340_v43, 5 }
  0x97   : > { %3430 = vmatpush3.bf16.msra.mxu0 %v4358_v17  ;;  %3417 = vmatprep.mubr.msk.bf16.mxu0 %vm435_vm4, %v3115_v38  ;;  %v2192_v17 = vor.u32 %v2191_v13, %v2188_v35  ;;  %v2174_v35 = vsel %vm3944_vm5, %v2169_v36, %v4515_v37  ;;  %v4573_v13 = vld [vmem:[%s3899_s4 + $0x74] sm:$0x1]  ;;  %v2207_v38 = vrot.slane %v2205_v41, 5  ;;  %v2216_v63 = vor.u32 %v2215_v23, %v2212_v24  ;;  %v3131_v23 = vld [vmem:[%s3899_s4 + $0x30] sm:$0xe] }
  0x98   : > { %3332 = vmatmul.mubr.msk.bf16.gmra.mrb[8].mxu1 %vm435_vm4, %v4863_v54  ;;  %v2226_v3 = vor.u32 %v2225_v44, %v4567_v59  ;;  %v2229_v37 = vshll.u32 %v4573_v13, 16  ;;  %v4865_v30 = vcombine.low %v4417_v34, %v4429_v46  ;;  %v3118_v26 = vcombine.low %v2174_v35, %v2184_v47 }
  0x99   : > { %3335 = vmatprep.mubr.msk.bf16.mxu1 %vm435_vm4, %v4864_v0  ;;  %v2193_v29 = vrot.slane %v2192_v17, 4  ;;  %v2208_v25 = vsel %vm3944_vm5, %v2203_v5, %v2207_v38  ;;  %v1324_v48 = vshrl.u32 %v2994_v31, 16  ;;  %v1327_v19 = vshll.u32 %v2994_v31, 16  ;;  %v2991_v0 = vld [vmem:[%s3899_s4 + $0x3c] sm:$0xf]  ;;  %v3670_v17 = vld [vmem:[%s3899_s4 + $0x24] sm:$0xff]  }
  0x9a   : > { %v3137_v34 = vrot.slane %v3129_v21, 9  ;;  %v2435_v46 = vrot.slane %v2433_v4, 4  ;;  %v2436_v42 = vrot.slane %v4370_v55, 5  ;;  %v1346_v12 = vsel %vm3944_vm5, %v1341_v45, %v1345_v49  ;;  %v3130_v55 = vld [vmem:[%s3899_s4 + $0x24] sm:$0xe]  ;;  %v3671_v31 = vld [vmem:[%s3899_s4 + $0x30] sm:$0xff]  }
  0x9b   : > { %v2198_v43 = vsel %vm3944_vm5, %v2193_v29, %v4533_v28  ;;  %v2217_v54 = vrot.slane %v2216_v63, 4  ;;  %v2227_v60 = vrot.slane %v2226_v3, 4  ;;  %v2231_v62 = vrot.slane %v2229_v37, 5  ;;  %v3669_v28 = vld [vmem:[%s3899_s4 + $0x18] sm:$0xff]  }
  0x9c   : > { %v1326_v36 = vrot.slane %v1324_v48, 4  ;;  %v3119_v58 = vcombine.low %v2198_v43, %v2208_v25  ;;  %v1329_v16 = vrot.slane %v1327_v19, 5  ;;  %v2434_v18 = vsel %vm4091_vm8, %v3137_v34, %v2433_v4  ;;  %v3672_v21 = vld [vmem:[%s3899_s4 + $0x3c] sm:$0xff]   ;;  %v2997_v48 = vld [vmem:[%s3899_s4 + $0x54] sm:$0xf] }
  0x9d   : > { %v2437_v41 = vsel %vm4091_vm8, %v2435_v46, %v2436_v42  ;;  %v2440_v20 = vrot.slane %v4384_v7, 5  ;;  %v2232_v24 = vsel %vm3944_vm5, %v2227_v60, %v2231_v62  ;;  %v2447_v44 = vrot.slane %v4402_v14, 5  ;;  %v3133_v42 = vld [vmem:[%s3899_s4 + $0x48] sm:$0xe] }
  0x9e   : > { %3418 = vmatmul.mubr.msk.bf16.gmra.mrb[4].mxu0 %vm435_vm4, %v3116_v40  ;;  %v1330_v33 = vor.u32 %v1329_v16, %v1326_v36  ;;  %v2222_v40 = vsel %vm3944_vm5, %v2217_v54, %v4567_v59  ;;  %v1303_v35 = vshll.u32 %v2991_v0, 16  ;;  %v1309_v7 = vshll.u32 %v4188_v56, 16 }
  0x9f   : > { %3421 = vmatprep.mubr.msk.bf16.mxu0 %vm435_vm4, %v3117_v61  ;;  %v1300_v61 = vshrl.u32 %v2991_v0, 16  ;;  %v3138_v59 = vrot.slane %v3130_v55, 9  ;;  %v2443_v14 = vrot.slane %v4425_v53, 5  ;;  %v3146_v29 = vcombine.low %v2434_v18, %v2437_v41  ;;  %v3673_v18 = vld [vmem:[%s3899_s4 + $0x48] sm:$0xff]  }
  0xa0   : > { %3336 = vmatmul.mubr.msk.bf16.gmra.mrb[12].mxu1 %vm435_vm4, %v4865_v30  ;;  %v1331_v47 = vrot.slane %v1330_v33, 4  ;;  %v2442_v5 = vrot.slane %v2440_v20, 4  ;;  %v3139_v38 = vrot.slane %v3131_v23, 9  ;;  %v3120_v49 = vcombine.low %v2222_v40, %v2232_v24  ;;  %v3674_v33 = vld [vmem:[%s3899_s4 + $0x54] sm:$0xff]  }
  0xa1   : > { %3341 = vmatprep.mubr.msk.bf16.mxu1 %vm435_vm4, %v3668_v1  ;;  %v1313_v1 = vshrl.u32 %v4188_v56, 16  ;;  %v2449_v4 = vrot.slane %v2447_v44, 4  ;;  %v2450_v56 = vrot.slane %v4432_v51, 5  ;;  %v1302_v63 = vrot.slane %v1300_v61, 4 }
  0xa2   : > { %v1336_v45 = vsel %vm3944_vm5, %v1331_v47, %v4535_v9  ;;  %v1305_v3 = vrot.slane %v1303_v35, 5  ;;  %v4629_v37 = vrot.slane %v1309_v7, 5  ;;  %v2441_v30 = vsel %vm4091_vm8, %v3138_v59, %v2440_v20  ;;  %v3134_v59 = vld [vmem:[%s3899_s4 + $0x54] sm:$0xe] }
  0xa3   : > { %v1315_v53 = vrot.slane %v1313_v1, 4  ;;  %v2444_v9 = vsel %vm4091_vm8, %v2442_v5, %v2443_v14  ;;  %v2448_v51 = vsel %vm4091_vm8, %v3139_v38, %v2447_v44  ;;  %v2454_v43 = vrot.slane %v4441_v2, 5  ;;  %v3000_v44 = vld [vmem:[%s3899_s4 + $0x60] sm:$0xf]  ;;  %v4866_v14 = vld [vmem:[#allocation8_spill] sm:$0xff] }
  0xa4   : > { %v1319_v25 = vshll.u32 %v4191_v10, 16  ;;  %v2451_v19 = vsel %vm4091_vm8, %v2449_v4, %v2450_v56  ;;  %v1306_v34 = vor.u32 %v1305_v3, %v1302_v63  ;;  %v3147_v2 = vcombine.low %v2441_v30, %v2444_v9  ;;  %v4868_v3 = vld [vmem:[#allocation5_spill] sm:$0xff] }
  0xa5   : > { %v1316_v46 = vor.u32 %v1315_v53, %v4629_v37  ;;  %v2457_v54 = vrot.slane %v4481_v15, 5  ;;  %v1348_v60 = vshrl.u32 %v2997_v48, 16  ;;  %v1351_v62 = vshll.u32 %v2997_v48, 16 }
  0xa6   : > { %3422 = vmatmul.mubr.msk.bf16.gmra.mrb[8].mxu0 %vm435_vm4, %v3118_v26  ;;  %v3132_v26 = vld [vmem:[%s3899_s4 + $0x3c] sm:$0xe]  ;;  %v1357_v36 = vshll.u32 %v4217_v50, 16  ;;  %v2456_v0 = vrot.slane %v2454_v43, 4  ;;  %v1321_v16 = vrot.slane %v1319_v25, 5  ;;  %v2464_v20 = vrot.slane %v4486_v22, 5 }
  0xa7   : > { %3425 = vmatprep.mubr.msk.bf16.mxu0 %vm435_vm4, %v3119_v58  ;;  %v3140_v10 = vrot.slane %v3132_v26, 9  ;;  %v3148_v58 = vcombine.low %v2448_v51, %v2451_v19  ;;  %v1317_v41 = vrot.slane %v1316_v46, 4  ;;  %v1350_v15 = vrot.slane %v1348_v60, 4  ;;  %v3675_v26 = vld [vmem:[%s3899_s4 + $0x60] sm:$0xff]  }
  0xa8   : > { %3342 = vmatmul.mubr.msk.bf16.vlgmr.msra.gmra.mrb[0].mxu1 %vm435_vm4, %v3669_v28  ;;  %v1361_v28 = vshrl.u32 %v4217_v50, 16  ;;  %v1353_v40 = vrot.slane %v1351_v62, 5  ;;  %v1359_v24 = vrot.slane %v1357_v36, 5  ;;  %v2458_v61 = vsel %vm4091_vm8, %v2456_v0, %v2457_v54 }
  0xa9   : > { %3448 = vmatpush3.bf16.msra.mxu1 %v3879_v6  ;;  %3345 = vmatprep.mubr.msk.bf16.mxu1 %vm435_vm4, %v3670_v17  ;;  %v4626_v6 = vcombine.low %v1336_v45, %v1346_v12  ;;  %v2461_v12 = vrot.slane %v4452_v11, 5  ;;  %v3141_v17 = vrot.slane %v3133_v42, 9  ;;  %v1307_v11 = vrot.slane %v1306_v34, 4  ;;  %v4867_v45 = vld [vmem:[#allocation6_spill] sm:$0xff] }
  0xaa   : > { %v1363_v23 = vrot.slane %v1361_v28, 4  ;;  %v2455_v50 = vsel %vm4091_vm8, %v3140_v10, %v2454_v43  ;;  %v2468_v22 = vrot.slane %v4474_v57, 5  ;;  %v1322_v1 = vsel %vm3944_vm5, %v1317_v41, %v1321_v16  ;;  %v3135_v57 = vld [vmem:[%s3899_s4 + $0x60] sm:$0xe]  ;;  %v3136_v16 = vld [vmem:[%s3899_s4 + $0x6c] sm:$0xe] }
  0xab   : > { %v2463_v55 = vrot.slane %v2461_v12, 4  ;;  %v2462_v35 = vsel %vm4091_vm8, %v3141_v17, %v2461_v12  ;;  %v1312_v7 = vsel %vm3944_vm5, %v1307_v11, %v4629_v37  ;;  %v1372_v5 = vshrl.u32 %v3000_v44, 16  ;;  %s2881_s4 = sshll.u32 %s175_s27, 6 }
  0xac   : > { %v1375_v38 = vshll.u32 %v3000_v44, 16  ;;  %v1385_v4 = vshrl.u32 %v4867_v45, 16  ;;  %v3149_v56 = vcombine.low %v2455_v50, %v2458_v61  ;;  %v1364_v63 = vor.u32 %v1363_v23, %v1359_v24  ;;  %s4732_s5 = scalar_lea.vmem [#allocation2], %s2881_s4 }
  0xad   : > { %v2465_v47 = vsel %vm4091_vm8, %v2463_v55, %v2464_v20  ;;  %v1367_v37 = vshll.u32 %v4868_v3, 16  ;;  %v2470_v30 = vrot.slane %v2468_v22, 4  ;;  %v2471_v9 = vrot.slane %v4522_v8, 5  ;;  %s2790_s8 = sshll.u32 %s4732_s5, 4  ;;  %s4780_s8 = int_to_ptr.vmem [resolvable:$true] %s2790_s8 }
  0xae   : > { %3426 = vmatmul.mubr.msk.bf16.gmra.mrb[12].mxu0 %vm435_vm4, %v3120_v49  ;;  %v1381_v49 = vshll.u32 %v4867_v45, 16  ;;  %v3150_v53 = vcombine.low %v2462_v35, %v2465_v47  ;;  %v3008_v51 = vcombine.low %v1312_v7, %v1322_v1  ;;  %v3143_v43 = vrot.slane %v3135_v57, 9  ;;  %s3676_s21 = scalar_lea.vmem %s4780_s8, 1024  ;;  %p3683_p2 = scmp.lt.s32.totalorder %s4780_s8, %s3681_s28 }
  0xaf   : > { %3431 = vmatprep.mubr.msk.bf16.mxu0 %vm435_vm4, %v3146_v29  ;;  %v2475_v29 = vrot.slane %v4866_v14, 5  ;;  %v2478_v48 = vrot.slane %v4543_v32, 5  ;;  %v1374_v19 = vrot.slane %v1372_v5, 4  ;;  %v1377_v34 = vrot.slane %v1375_v38, 5  ;;  %p3677_p13 = scmp.ne.s32.totalorder %s4780_s8, %s3676_s21  ;;  %p3684_p4 = scmp.lt.s32.totalorder %s3682_s29, %s3676_s21 }
  0xb0   : > { %3346 = vmatmul.mubr.msk.bf16.gmra.mrb[4].mxu1 %vm435_vm4, %v3671_v31  ;;  %v1354_v31 = vor.u32 %v1353_v40, %v1350_v15  ;;  %v1383_v46 = vrot.slane %v1381_v49, 5  ;;  %v1387_v42 = vrot.slane %v1385_v4, 4  ;;  %v1369_v10 = vrot.slane %v1367_v37, 5 }
  0xb1   : > { %3349 = vmatprep.mubr.msk.bf16.mxu1 %vm435_vm4, %v3672_v21  ;;  %v3142_v21 = vrot.slane %v3134_v59, 9  ;;  %v2477_v25 = vrot.slane %v2475_v29, 4  ;;  %v2472_v32 = vsel %vm4091_vm8, %v2470_v30, %v2471_v9  ;;  %v2476_v54 = vsel %vm4091_vm8, %v3143_v43, %v2475_v29  ;;  %p3678_p0 = pnand %p3677_p13, %p3847_p3  ;;  %p3685_p5 = por %p3684_p4, %p3683_p2 }
  0xb2   : > { %v1355_v12 = vrot.slane %v1354_v31, 4  ;;  %v2482_v60 = vrot.slane %v4531_v52, 5  ;;  %v1378_v36 = vor.u32 %v1377_v34, %v1374_v19  ;;  %v1388_v28 = vor.u32 %v1387_v42, %v1383_v46 }
  0xb3   : > { %v2469_v8 = vsel %vm4091_vm8, %v3142_v21, %v2468_v22  ;;  %v2479_v62 = vsel %vm4091_vm8, %v2477_v25, %v2478_v48  ;;  %v3144_v55 = vrot.slane %v3136_v16, 9  ;;  %v2485_v20 = vrot.slane %v4573_v13, 5  ;;  %p3679_p1 = pneg %p3678_p0 }
  0xb4   : > { %v1360_v17 = vsel %vm3944_vm5, %v1355_v12, %v1359_v24  ;;  %v3151_v11 = vcombine.low %v2469_v8, %v2472_v32  ;;  %v3152_v41 = vcombine.low %v2476_v54, %v2479_v62  ;;  %v2484_v52 = vrot.slane %v2482_v60, 4 }
  0xb5   : > { %v1379_v15 = vrot.slane %v1378_v36, 4  ;;  %v1389_v40 = vrot.slane %v1388_v28, 4  ;;  %v2483_v24 = vsel %vm4091_vm8, %v3144_v55, %v2482_v60  ;;  %p3686_p6 = pnand %p3685_p5, %p3679_p1 }
  0xb6   : > { %3432 = vmatmul.mubr.msk.bf16.vlgmr.msra.gmra.mrb[0].mxu0 %vm435_vm4, %v3147_v2  ;;  %v1365_v2 = vrot.slane %v1364_v63, 4  ;;  %v2486_v44 = vsel %vm4091_vm8, %v2484_v52, %v2485_v20 }
  0xb7   : > { %3435 = vmatprep.mubr.msk.bf16.mxu0 %vm435_vm4, %v3148_v58  ;;  %v4869_v58 = vld [vmem:[#allocation7_spill] sm:$0xff]  ;;  %v1384_v13 = vsel %vm3944_vm5, %v1379_v15, %v1383_v46  ;;  %v3153_v61 = vcombine.low %v2483_v24, %v2486_v44 }
  0xb8   : > { %3350 = vmatmul.mubr.msk.bf16.gmra.mrb[8].mxu1 %vm435_vm4, %v3673_v18  ;;  %v1391_v0 = vshll.u32 %v4869_v58, 16  ;;  %v1370_v18 = vsel %vm3944_vm5, %v1365_v2, %v1369_v10 }
  0xb9   : > { %3353 = vmatprep.mubr.msk.bf16.mxu1 %vm435_vm4, %v3674_v33  ;;  %v3010_v33 = vcombine.low %v1360_v17, %v1370_v18 }
  0xba   : > { %v1393_v23 = vrot.slane %v1391_v0, 5 }
  0xbc   : > { %v1394_v50 = vsel %vm3944_vm5, %v1389_v40, %v1393_v23 }
  0xbd   : > { %v3011_v35 = vcombine.low %v1384_v13, %v1394_v50 }
  0xbe   : > { %3436 = vmatmul.mubr.msk.bf16.gmra.mrb[4].mxu0 %vm435_vm4, %v3149_v56 }
  0xbf   : > { %3439 = vmatprep.mubr.msk.bf16.mxu0 %vm435_vm4, %v3150_v53 }
  0xc0   : > { %3354 = vmatmul.mubr.msk.bf16.gmra.mrb[12].mxu1 %vm435_vm4, %v3675_v26 }
  0xc1   : > { %3367 = vmatprep.mubr.msk.bf16.mxu1 %vm435_vm4, %v3008_v51 }
  0xc6   : > { %3440 = vmatmul.mubr.msk.bf16.gmra.mrb[8].mxu0 %vm435_vm4, %v3151_v11 }
  0xc7   : > { %3443 = vmatprep.mubr.msk.bf16.mxu0 %vm435_vm4, %v3152_v41 }
  0xc8   : > { %3368 = vmatmul.mubr.msk.bf16.vlgmr.msra.gmra.mrb[8].mxu1 %vm435_vm4, %v4626_v6 }
  0xc9   : > { %3371 = vmatprep.mubr.msk.bf16.mxu1 %vm435_vm4, %v3010_v33 }
  0xce   : > { %3444 = vmatmul.mubr.msk.bf16.gmra.mrb[12].mxu0 %vm435_vm4, %v3153_v61 }
  0xd0   : > { %3372 = vmatmul.mubr.msk.bf16.gmra.mrb[12].mxu1 %vm435_vm4, %v3011_v35 }
 0x17b   : > { %v3343_v6 = vpop.f32.mrb[0].mxu1 }
 0x17c   : > { %v1100_v22 = vpop.f32.mrb[1].mxu1 }
 0x17d   : > { %v3344_v27 = vpop.f32.mrb[2].mxu1 }
 0x17e   : > { %v1103_v7 = vpop.f32.mrb[3].mxu1 }
 0x183   : > { %v3347_v1 = vpop.f32.mrb[4].mxu1 }
 0x184   : > { %v1116_v47 = vpop.f32.mrb[5].mxu1 }
 0x185   : > { %v3348_v59 = vpop.f32.mrb[6].mxu1 }
 0x186   : > { %v1119_v14 = vpop.f32.mrb[7].mxu1 }
 0x189   : > { %v3433_v29 = vpop.f32.mrb[0].mxu0 }
 0x18a   : > { %v3449_v57 = vadd.f32 %v3433_v29, %v3343_v6  ;;  %v2574_v5 = vpop.f32.mrb[1].mxu0 }
 0x18b   : > { %v3450_v38 = vadd.f32 %v2574_v5, %v1100_v22  ;;  %v3434_v45 = vpop.f32.mrb[2].mxu0 }
 0x18c   : > { %v2662_v49 = vadd.f32 %v3449_v57, %v4724_v39  ;;  %v3451_v4 = vadd.f32 %v3434_v45, %v3344_v27  ;;  %v2577_v56 = vpop.f32.mrb[3].mxu0 }
 0x18d   : > { %v2660_v31 = vadd.f32 %v3450_v38, %v4724_v39  ;;  %v3452_v63 = vadd.f32 %v2577_v56, %v1103_v7 }
 0x18e   : > { %v2678_v3 = vmax.f32 %v2662_v49, 0.0  ;;  %v2663_v37 = vadd.f32 %v3451_v4, %v4724_v39 }
 0x18f   : > { %v2676_v53 = vmax.f32 %v2660_v31, 0.0  ;;  %v2661_v21 = vadd.f32 %v3452_v63, %v4724_v39 }
 0x190   : > { %v3189_v30 = vpack.c.bf16 %v2678_v3, %v2678_v3  ;;  %v2679_v9 = vmax.f32 %v2663_v37, 0.0 }
 0x191   : > { %v3187_v26 = vpack.c.bf16 %v2676_v53, %v2676_v53  ;;  %v2677_v51 = vmax.f32 %v2661_v21, 0.0  ;;  %v3437_v43 = vpop.f32.mrb[4].mxu0 }
 0x192   : > { %2759 = vst.msk [vmem:[%s4732_s5 + $0x8] sm:$0xf] %vm2756_vm9, %v3189_v30  ;;  %v3190_v25 = vpack.c.bf16 %v2679_v9, %v2679_v9  ;;  %v3453_v48 = vadd.f32 %v3437_v43, %v3347_v1  ;;  %v2590_v19 = vpop.f32.mrb[5].mxu0 }
 0x193   : > { %2757 = vst.msk [vmem:[%s4732_s5] sm:$0xf] %vm2756_vm9, %v3187_v26  ;;  %v3188_v34 = vpack.c.bf16 %v2677_v51, %v2677_v51  ;;  %v3454_v46 = vadd.f32 %v2590_v19, %v1116_v47  ;;  %v3438_v42 = vpop.f32.mrb[6].mxu0 }
 0x194   : > { %2760 = vst.msk [vmem:[%s4732_s5 + $0xc] sm:$0xf] %vm2756_vm9, %v3190_v25  ;;  %v2666_v12 = vadd.f32 %v3453_v48, %v4724_v39  ;;  %v3455_v2 = vadd.f32 %v3438_v42, %v3348_v59  ;;  %v2593_v10 = vpop.f32.mrb[7].mxu0 }
 0x195   : > { %2758 = vst.msk [vmem:[%s4732_s5 + $0x4] sm:$0xf] %vm2756_vm9, %v3188_v34  ;;  %v2664_v8 = vadd.f32 %v3454_v46, %v4724_v39  ;;  %v3456_v32 = vadd.f32 %v2593_v10, %v1119_v14 }
 0x196   : > { %v2682_v54 = vmax.f32 %v2666_v12, 0.0  ;;  %v2667_v60 = vadd.f32 %v3455_v2, %v4724_v39 }
 0x197   : > { %v2680_v62 = vmax.f32 %v2664_v8, 0.0  ;;  %v2665_v36 = vadd.f32 %v3456_v32, %v4724_v39 }
 0x198   : > { %v3193_v28 = vpack.c.bf16 %v2682_v54, %v2682_v54  ;;  %v2683_v58 = vmax.f32 %v2667_v60, 0.0 }
 0x199   : > { %v3191_v0 = vpack.c.bf16 %v2680_v62, %v2680_v62  ;;  %v2681_v16 = vmax.f32 %v2665_v36, 0.0  ;;  %v3441_v17 = vpop.f32.mrb[8].mxu0 }
 0x19a   : > { %2763 = vst.msk [vmem:[%s4732_s5 + $0x18] sm:$0xf] %vm2756_vm9, %v3193_v28  ;;  %v3194_v18 = vpack.c.bf16 %v2683_v58, %v2683_v58  ;;  %v2606_v41 = vpop.f32.mrb[9].mxu0 }
 0x19b   : > { %v3369_v11 = vpop.f32.mrb[8].mxu1  ;;  %2761 = vst.msk [vmem:[%s4732_s5 + $0x10] sm:$0xf] %vm2756_vm9, %v3191_v0  ;;  %v3192_v55 = vpack.c.bf16 %v2681_v16, %v2681_v16  ;;  %v3442_v33 = vpop.f32.mrb[10].mxu0 }
 0x19c   : > { %v3457_v52 = vadd.f32 %v3441_v17, %v3369_v11  ;;  %v1514_v20 = vpop.f32.mrb[9].mxu1  ;;  %2764 = vst.msk [vmem:[%s4732_s5 + $0x1c] sm:$0xf] %vm2756_vm9, %v3194_v18  ;;  %v2609_v23 = vpop.f32.mrb[11].mxu0 }
 0x19d   : > { %v3458_v15 = vadd.f32 %v2606_v41, %v1514_v20  ;;  %v3370_v40 = vpop.f32.mrb[10].mxu1  ;;  %2762 = vst.msk [vmem:[%s4732_s5 + $0x14] sm:$0xf] %vm2756_vm9, %v3192_v55 }
 0x19e   : > { %v2670_v24 = vadd.f32 %v3457_v52, %v4724_v39  ;;  %v3459_v44 = vadd.f32 %v3442_v33, %v3370_v40  ;;  %v1517_v13 = vpop.f32.mrb[11].mxu1 }
 0x19f   : > { %v2668_v50 = vadd.f32 %v3458_v15, %v4724_v39  ;;  %v3460_v61 = vadd.f32 %v2609_v23, %v1517_v13 }
 0x1a0   : > { %v2686_v35 = vmax.f32 %v2670_v24, 0.0  ;;  %v2671_v6 = vadd.f32 %v3459_v44, %v4724_v39 }
 0x1a1   : > { %v2684_v22 = vmax.f32 %v2668_v50, 0.0  ;;  %v2669_v27 = vadd.f32 %v3460_v61, %v4724_v39  ;;  %v3445_v47 = vpop.f32.mrb[12].mxu0 }
 0x1a2   : > { %v3197_v7 = vpack.c.bf16 %v2686_v35, %v2686_v35  ;;  %v2687_v1 = vmax.f32 %v2671_v6, 0.0  ;;  %v2622_v57 = vpop.f32.mrb[13].mxu0 }
 0x1a3   : > { %v3195_v59 = vpack.c.bf16 %v2684_v22, %v2684_v22  ;;  %v2685_v14 = vmax.f32 %v2669_v27, 0.0  ;;  %v3373_v29 = vpop.f32.mrb[12].mxu1  ;;  %v3446_v49 = vpop.f32.mrb[14].mxu0 }
 0x1a4   : > { %2767 = vst.msk [vmem:[%s4732_s5 + $0x28] sm:$0xf] %vm2756_vm9, %v3197_v7  ;;  %v3198_v5 = vpack.c.bf16 %v2687_v1, %v2687_v1  ;;  %v3461_v38 = vadd.f32 %v3445_v47, %v3373_v29  ;;  %v1530_v45 = vpop.f32.mrb[13].mxu1  ;;  %v2625_v63 = vpop.f32.mrb[15].mxu0 }
 0x1a5   : > { %2765 = vst.msk [vmem:[%s4732_s5 + $0x20] sm:$0xf] %vm2756_vm9, %v3195_v59  ;;  %v3196_v4 = vpack.c.bf16 %v2685_v14, %v2685_v14  ;;  %v3462_v56 = vadd.f32 %v2622_v57, %v1530_v45  ;;  %v3374_v31 = vpop.f32.mrb[14].mxu1 }
 0x1a6   : > { %2768 = vst.msk [vmem:[%s4732_s5 + $0x2c] sm:$0xf] %vm2756_vm9, %v3198_v5  ;;  %v2674_v3 = vadd.f32 %v3461_v38, %v4724_v39  ;;  %v3463_v37 = vadd.f32 %v3446_v49, %v3374_v31  ;;  %v1533_v53 = vpop.f32.mrb[15].mxu1 }
 0x1a7   : > { %2766 = vst.msk [vmem:[%s4732_s5 + $0x24] sm:$0xf] %vm2756_vm9, %v3196_v4  ;;  %v2672_v21 = vadd.f32 %v3462_v56, %v4724_v39  ;;  %v3464_v30 = vadd.f32 %v2625_v63, %v1533_v53 }
 0x1a8   : > { %v2690_v9 = vmax.f32 %v2674_v3, 0.0  ;;  %v2675_v26 = vadd.f32 %v3463_v37, %v4724_v39 }
 0x1a9   : > { %v2688_v51 = vmax.f32 %v2672_v21, 0.0  ;;  %v2673_v43 = vadd.f32 %v3464_v30, %v4724_v39 }
 0x1aa   : > { %v3201_v25 = vpack.c.bf16 %v2690_v9, %v2690_v9  ;;  %v2691_v48 = vmax.f32 %v2675_v26, 0.0 }
 0x1ab   : > { %v3199_v19 = vpack.c.bf16 %v2688_v51, %v2688_v51  ;;  %v2689_v34 = vmax.f32 %v2673_v43, 0.0 }
 0x1ac   : > { %2771 = vst.msk [vmem:[%s4732_s5 + $0x38] sm:$0xf] %vm2756_vm9, %v3201_v25  ;;  %v3202_v46 = vpack.c.bf16 %v2691_v48, %v2691_v48 }
 0x1ad   : > { %2769 = vst.msk [vmem:[%s4732_s5 + $0x30] sm:$0xf] %vm2756_vm9, %v3199_v19  ;;  %v3200_v39 = vpack.c.bf16 %v2689_v34, %v2689_v34 }
 0x1ae   : > { %2772 = vst.msk [vmem:[%s4732_s5 + $0x3c] sm:$0xf] %vm2756_vm9, %v3202_v46 }
 0x1af   : > { %2770 = vst.msk [vmem:[%s4732_s5 + $0x34] sm:$0xf] %vm2756_vm9, %v3200_v39 }
 0x1b0   : > { %3689 = shalt.err (!%p3686_p6)
}
 0x1b1   : > { %s3690_s27 = scalar_lea.hbm %s4778_s11, 1024  ;;  %s3694_s6 = scalar_lea.hbm %s4845_s3, 4096 }
 0x1b2   : > { %p3691_p7 = scmp.ne.s32.totalorder %s4778_s11, %s3690_s27  ;;  %p3695_p11 = scmp.lt.u32.totalorder %s4778_s11, %s4845_s3 }
 0x1b3   : > { %p3696_p12 = scmp.lt.u32.totalorder %s3694_s6, %s3690_s27  ;;  %p3698_p0 = scmp.lt.u32.totalorder %s3690_s27, %s4778_s11 }
 0x1b4   : > { %p3692_p9 = pnand %p3691_p7, %p3847_p3 }
 0x1b5   : > { %p3697_p13 = por %p3696_p12, %p3695_p11 }
 0x1b6   : > { %p3693_p10 = pneg %p3692_p9 }
 0x1b7   : > { %p3699_p1 = por %p3698_p0, %p3697_p13 }
 0x1b9   : > { %p3700_p2 = pnand %p3699_p1, %p3693_p10 }
 0x1bb   : > { %3703 = shalt.err (!%p3700_p2)
}
 0x1bc   : > { %s3774_s16 = smov 64   ;;  %s3775_s9 = smov 4  }
 0x1bd   : > { %3578 = dma.vmem_to_hbm [thread:$0]  (%p3847_p3), %s4780_s8, 1024, %s4778_s11, %s4790_s20, %s3774_s16, %s3774_s16, %s3775_s9  }
 0x1be PF: > { %p3584_p4 = scmp.ge.s32.totalorder %s3770_s19, 2  ;;  %s2805_s10 = sand.u32 1, %s3742_s12  }
 0x1bf   : > { %s2806_s21 = scalar_lea.sflag [#allocation3], %s2805_s10 }
 0x1c0   : > { %p3581_p5 = pnand %p3584_p4, %p3856_p8 }
 0x1c2   : > { %3737 = dma.done.wait (!%p3581_p5), %s2806_s21, 1024  }
 0x1c3   : > { %3739 = vsyncadd (!%p3581_p5), %s2806_s21, 4294966272  ;;  %s16_s19 = sadd.s32 1, %s3770_s19   ;;  %s4870_s12 = smov %s3746_s13 }
 0x1c4   : > { %p13_p6 = scmp.ge.s32.totalorder %s16_s19, 6   ;;  %s4871_s13 = smov %s3750_s14 }
 0x1c5   : > { %s4872_s14 = smov %s3865_s30  ;;  %s4873_s15 = smov %s3762_s17 }
 0x1c6   : > { %s4874_s16 = smov %s3766_s18  ;;  %s4875_s17 = smov %s4878_s22 }
 0x1c7   : > { %s4876_s18 = smov %s4882_s23  ;;  %15 = sbr.rel (!%p13_p6) target bundleno = 5 (0x5), region = 78 }
 0x1ce   :  { %2811 = vsyncpa [#allocation3], 1 }
 0x1cf   :  { %2813 = vsyncpa [#allocation3 + $0x1], 1 }

</bundles_post_ra>
